<compile_context>
chip_gen: v7x
topology: tpu7x:2x2x1
jax: 0.10.0
libtpu: 0.0.40
codegen_flags: <defaults>
</compile_context>

<pallas_src>
import numpy as np

import jax
import jax.numpy as jnp
from jax import lax
from jax.experimental import pallas as pl
from jax.experimental.pallas import tpu as pltpu

# ---- tiny model config ------------------------------------------------------
B, S = 2, 8          # batch, sequence length
H = 32               # hidden size
NUM_HEADS = 4
DH = H // NUM_HEADS  # head dim
INTER = 64           # MLP intermediate size
LAYERS = 2
VOCAB = 64
PAD_ID = 0
EPS = 1e-6
NEG_INF = -1e30
LANES = 128

# rotate-half permutation-sign matrix (block-diagonal per head); used ONLY at
# init time to fold RoPE's rotate-half into the QKV projection weights.
_half = DH // 2
_r = np.zeros((DH, DH), np.float32)
_r[np.arange(_half) + _half, np.arange(_half)] = -1.0
_r[np.arange(_half), np.arange(_half) + _half] = 1.0
ROT_HALF = np.kron(np.eye(NUM_HEADS, dtype=np.float32), _r)   # [H, H]

# ---- weight-slab row layout (single VMEM input, 128 lanes wide) -------------
R_EMB = 0                          # embedding table          [VOCAB, H]
R_CS = R_EMB + VOCAB               # RoPE cos|sin pre-tiled   [B*S, 2H]
R_NORM = R_CS + B * S              # ln1(L) ln2(L) lnf wscore (1 row each)
R_BIAS = R_NORM + 8                # b1(L rows, 128 wide), b2(L rows, H wide)
R_W1 = R_BIAS + 8                  # [wq|wk|wv|wq@rot] per layer: H rows x 128
R_W2 = R_W1 + LAYERS * H           # [wk@rot] per layer:        H rows (0:H)
R_WO = R_W2 + LAYERS * H           # wo per layer:              H rows (0:H)
R_WGU = R_WO + LAYERS * H          # [wg|wu] per layer:         H rows x 128
R_WD = R_WGU + LAYERS * H          # wd per layer:          INTER rows (0:H)
TOTAL_ROWS = R_WD + LAYERS * INTER                      # 480 rows (~240 KB)


def _rmsnorm(x, w):
    var = jnp.mean(x * x, axis=-1, keepdims=True)
    return x * lax.rsqrt(var + EPS) * w


def reward_kernel(ids_ref, mask_ref, w_ref, out_ref):
    ids = ids_ref[...]          # [B*S, 1] int32 token ids
    mask = mask_ref[...]        # [B, S]   int32 (1 = real token, 0 = pad)

    # ---- embedding gather as a one-hot matmul (8 KB table lives in the slab)
    onehot = (lax.broadcasted_iota(jnp.int32, (B * S, VOCAB), 1) == ids)
    onehot = onehot.astype(jnp.float32)
    x = jnp.dot(onehot, w_ref[R_EMB:R_EMB + VOCAB, :],
                preferred_element_type=jnp.float32)[:, 0:H]         # [B*S, H]

    cos = w_ref[R_CS:R_CS + B * S, 0:H]                             # [B*S, H]
    sin = w_ref[R_CS:R_CS + B * S, H:2 * H]                         # [B*S, H]

    # ---- additive attention mask (causal AND key-not-pad), tiled over heads
    q_pos = lax.broadcasted_iota(jnp.int32, (S, S), 0)
    k_pos = lax.broadcasted_iota(jnp.int32, (S, S), 1)
    causal = (k_pos <= q_pos)[None, :, :]                           # [1, S, S]
    key_ok = (mask != 0)[:, None, :]                                # [B, 1, S]
    allow = jnp.logical_and(causal, key_ok)                         # [B, S, S]
    bias_b = jnp.where(allow, 0.0, NEG_INF).astype(jnp.float32)
    bias = jnp.concatenate([bias_b] * NUM_HEADS, axis=0)            # [B*NH,S,S]

    for l in range(LAYERS):
        # ---- self-attention block ----
        hn = _rmsnorm(x, w_ref[R_NORM + l:R_NORM + l + 1, 0:H])
        # fused projection 1: [q | k | v | q_rot]  (q pre-scaled by 1/sqrt(DH))
        o1 = jnp.dot(hn, w_ref[R_W1 + l * H:R_W1 + (l + 1) * H, :],
                     preferred_element_type=jnp.float32)
        o1 = o1 + w_ref[R_BIAS + l:R_BIAS + l + 1, :]               # [B*S, 4H]
        # fused projection 2: [k_rot] (lanes 0:H; rest of the slab block is 0)
        o2 = jnp.dot(hn, w_ref[R_W2 + l * H:R_W2 + (l + 1) * H, :],
                     preferred_element_type=jnp.float32)
        o2 = o2 + w_ref[R_BIAS + LAYERS + l:R_BIAS + LAYERS + l + 1, :]

        q = o1[:, 0:H]
        k = o1[:, H:2 * H]
        v = o1[:, 2 * H:3 * H]
        q_rot = o1[:, 3 * H:4 * H]
        k_rot = o2[:, 0:H]

        # RoPE (rotate-half already folded into the weights): pure VPU work
        q = q * cos + q_rot * sin
        k = k * cos + k_rot * sin

        # gather heads onto a merged (head, batch) leading axis: [B*NH, S, DH]
        q3 = q.reshape(B, S, H)
        k3 = k.reshape(B, S, H)
        v3 = v.reshape(B, S, H)
        qh = jnp.concatenate(
            [q3[:, :, h * DH:(h + 1) * DH] for h in range(NUM_HEADS)], axis=0)
        kh = jnp.concatenate(
            [k3[:, :, h * DH:(h + 1) * DH] for h in range(NUM_HEADS)], axis=0)
        vh = jnp.concatenate(
            [v3[:, :, h * DH:(h + 1) * DH] for h in range(NUM_HEADS)], axis=0)

        # one batched score matmul + ONE masked softmax chain over all heads
        sc = jnp.einsum('nqd,nkd->nqk', qh, kh,
                        preferred_element_type=jnp.float32) + bias
        sc = sc - jnp.max(sc, axis=-1, keepdims=True)
        p = jnp.exp(sc)
        p = p / jnp.sum(p, axis=-1, keepdims=True)   # exact divide (parity)
        ctx = jnp.einsum('nqk,nkd->nqd', p, vh,
                         preferred_element_type=jnp.float32)        # [B*NH,S,DH]

        # re-concat heads along lanes, single W_o matmul
        ctx_c = jnp.concatenate(
            [ctx[h * B:(h + 1) * B] for h in range(NUM_HEADS)], axis=-1)
        attn = jnp.dot(ctx_c.reshape(B * S, H),
                       w_ref[R_WO + l * H:R_WO + (l + 1) * H, :],
                       preferred_element_type=jnp.float32)[:, 0:H]
        x = x + attn

        # ---- SwiGLU MLP block (fused gate/up -> full 128-lane matmul) ----
        hn2 = _rmsnorm(
            x, w_ref[R_NORM + LAYERS + l:R_NORM + LAYERS + l + 1, 0:H])
        gu = jnp.dot(hn2, w_ref[R_WGU + l * H:R_WGU + (l + 1) * H, :],
                     preferred_element_type=jnp.float32)            # [B*S,2*I]
        g = gu[:, :INTER]
        u = gu[:, INTER:]
        m = g * jax.nn.sigmoid(g) * u
        x = x + jnp.dot(m, w_ref[R_WD + l * INTER:R_WD + (l + 1) * INTER, :],
                        preferred_element_type=jnp.float32)[:, 0:H]

    # ---- final norm + score head (VPU multiply + lane reduce, no MXU) ----
    xf = _rmsnorm(x, w_ref[R_NORM + 2 * LAYERS:R_NORM + 2 * LAYERS + 1, 0:H])
    wscore = w_ref[R_NORM + 2 * LAYERS + 1:R_NORM + 2 * LAYERS + 2, 0:H]
    logits = jnp.sum(xf.reshape(B, S, H) * wscore, axis=-1)         # [B, S]

    # ---- last-non-pad-token pooling (HF wrap-around on all-pad rows) ----
    n_tok = jnp.sum(mask, axis=-1, keepdims=True)                   # [B, 1]
    last = jnp.where(n_tok > 0, n_tok - 1, S - 1)                   # [B, 1]
    pos = lax.broadcasted_iota(jnp.int32, (B, S), 1)
    sel = pos == last
    out_ref[...] = jnp.sum(jnp.where(sel, logits, 0.0),
                           axis=-1, keepdims=True)                  # [B, 1]


def init_params(key):
    ks = jax.random.split(key, 12)

    def nrm(k, shape, scale=0.02):
        return scale * jax.random.normal(k, shape, jnp.float32)

    return {
        'emb': nrm(ks[0], (VOCAB, H)),
        'ln1': jnp.ones((LAYERS, H), jnp.float32),
        'ln2': jnp.ones((LAYERS, H), jnp.float32),
        'lnf': jnp.ones((H,), jnp.float32),
        'wq': nrm(ks[1], (LAYERS, H, H)), 'bq': nrm(ks[2], (LAYERS, H), 0.01),
        'wk': nrm(ks[3], (LAYERS, H, H)), 'bk': nrm(ks[4], (LAYERS, H), 0.01),
        'wv': nrm(ks[5], (LAYERS, H, H)), 'bv': nrm(ks[6], (LAYERS, H), 0.01),
        'wo': nrm(ks[7], (LAYERS, H, H)),
        'wg': nrm(ks[8], (LAYERS, H, INTER)),
        'wu': nrm(ks[9], (LAYERS, H, INTER)),
        'wd': nrm(ks[10], (LAYERS, INTER, H)),
        'wscore': nrm(ks[11], (H,)),
    }


def build_weight_slab(params):
    """Pack every weight/constant into one [480, 128] f32 slab (init time, once).

    RoPE rotate-half and the 1/sqrt(DH) score scale are folded into the fused
    QKV weights here, so the kernel needs no rotate matmuls and no score scale.
    """
    p = {k: np.asarray(v, np.float32) for k, v in params.items()}
    rot = ROT_HALF
    scale = np.float32(1.0 / np.sqrt(DH))

    slab = np.zeros((TOTAL_ROWS, LANES), np.float32)

    # embedding table
    slab[R_EMB:R_EMB + VOCAB, :H] = p['emb']

    # RoPE cos/sin, pre-tiled to [B*S, H] (per head, then per batch)
    pos = np.arange(S, dtype=np.float32)
    inv_freq = 1.0 / (10000.0 ** (np.arange(0, DH, 2, dtype=np.float32) / DH))
    freqs = pos[:, None] * inv_freq[None, :]
    ang = np.concatenate([freqs, freqs], axis=-1)                   # [S, DH]
    cos = np.tile(np.tile(np.cos(ang), (1, NUM_HEADS)), (B, 1))     # [B*S, H]
    sin = np.tile(np.tile(np.sin(ang), (1, NUM_HEADS)), (B, 1))
    slab[R_CS:R_CS + B * S, 0:H] = cos
    slab[R_CS:R_CS + B * S, H:2 * H] = sin

    # norm weights + score head
    slab[R_NORM:R_NORM + LAYERS, :H] = p['ln1']
    slab[R_NORM + LAYERS:R_NORM + 2 * LAYERS, :H] = p['ln2']
    slab[R_NORM + 2 * LAYERS, :H] = p['lnf']
    slab[R_NORM + 2 * LAYERS + 1, :H] = p['wscore']

    for l in range(LAYERS):
        wq, wk, wv = p['wq'][l], p['wk'][l], p['wv'][l]
        bq, bk, bv = p['bq'][l], p['bk'][l], p['bv'][l]
        # fused projection 1: [q*scale | k | v | (q@rot)*scale]  -> 128 lanes
        w1 = np.concatenate([wq * scale, wk, wv, (wq @ rot) * scale], axis=-1)
        b1 = np.concatenate([bq * scale, bk, bv, (bq @ rot) * scale], axis=-1)
        slab[R_W1 + l * H:R_W1 + (l + 1) * H, :] = w1
        slab[R_BIAS + l, :] = b1
        # fused projection 2: [k@rot]
        slab[R_W2 + l * H:R_W2 + (l + 1) * H, :H] = wk @ rot
        slab[R_BIAS + LAYERS + l, :H] = bk @ rot
        # output / MLP weights
        slab[R_WO + l * H:R_WO + (l + 1) * H, :H] = p['wo'][l]
        slab[R_WGU + l * H:R_WGU + (l + 1) * H, :2 * INTER] = np.concatenate(
            [p['wg'][l], p['wu'][l]], axis=-1)
        slab[R_WD + l * INTER:R_WD + (l + 1) * INTER, :H] = p['wd'][l]

    return jnp.asarray(slab)


@jax.jit
def reward_model_forward(weight_slab, input_ids, attention_mask):
    """RewardModel.forward: scalar reward logit per sequence, shape [B]."""
    ids_col = input_ids.reshape(B * S, 1).astype(jnp.int32)
    mask = attention_mask.astype(jnp.int32)

    vmem = pl.BlockSpec(memory_space=pltpu.MemorySpace.VMEM)
    pooled = pl.pallas_call(
        reward_kernel,
        out_shape=jax.ShapeDtypeStruct((B, 1), jnp.float32),
        in_specs=[vmem, vmem, vmem],
        out_specs=vmem,
    )(ids_col, mask, weight_slab)
    return pooled[:, 0]                              # [B]


if __name__ == "__main__":
    key = jax.random.PRNGKey(0)
    pkey, ikey = jax.random.split(key)
    params = init_params(pkey)
    # TODO(synk): pretrained Qwen2.5-0.5B checkpoint / tokenizer have no
    #             in-script equivalent; a tiny deterministic stand-in is used.
    weight_slab = build_weight_slab(params)   # built ONCE, outside the jit path

    input_ids = jax.random.randint(ikey, (B, S), 1, VOCAB, dtype=jnp.int32)
    attention_mask = jnp.array([[1, 1, 1, 1, 1, 1, 1, 1],
                                [1, 1, 1, 1, 1, 0, 0, 0]], dtype=jnp.int32)
    input_ids = jnp.where(attention_mask == 1, input_ids, PAD_ID)

    out = reward_model_forward(weight_slab, input_ids, attention_mask)
    out = jax.block_until_ready(out)
    assert out.shape == (B,) and out.dtype == jnp.float32
    assert bool(jnp.all(jnp.isfinite(out)))
    print("KERNEL_OK")
</pallas_src>

<mosaic_0001>
module attributes {stable_mosaic.version = 11 : i64} {
  func.func @reward_kernel(%arg0: memref<16x1xi32, #tpu.memory_space<vmem>>, %arg1: memref<2x8xi32, #tpu.memory_space<vmem>>, %arg2: memref<480x128xf32, #tpu.memory_space<vmem>>, %arg3: memref<2x1xf32, #tpu.memory_space<vmem>>) attributes {dimension_semantics = [], scalar_prefetch = 0 : i64, scratch_operands = 0 : i64, tpu.core_type = #tpu.core_type<tc>} {
    %c0 = arith.constant 0 : index
    %c0_0 = arith.constant 0 : index
    %0 = vector.load %arg0[%c0, %c0_0] : memref<16x1xi32, #tpu.memory_space<vmem>>, vector<16x1xi32>
    %c0_1 = arith.constant 0 : index
    %c0_2 = arith.constant 0 : index
    %1 = vector.load %arg1[%c0_1, %c0_2] : memref<2x8xi32, #tpu.memory_space<vmem>>, vector<2x8xi32>
    %2 = tpu.iota {dimensions = array<i32: 1>} : vector<16x64xi32>
    %3 = vector.broadcast %0 : vector<16x1xi32> to vector<16x64xi32>
    %4 = arith.cmpi eq, %2, %3 : vector<16x64xi32>
    %5 = arith.extui %4 : vector<16x64xi1> to vector<16x64xi32>
    %6 = arith.sitofp %5 : vector<16x64xi32> to vector<16x64xf32>
    %c0_3 = arith.constant 0 : index
    %c0_4 = arith.constant 0 : index
    %7 = vector.load %arg2[%c0_3, %c0_4] : memref<480x128xf32, #tpu.memory_space<vmem>>, vector<64x128xf32>
    %cst = arith.constant dense<0.000000e+00> : vector<16x128xf32>
    %8 = tpu.matmul %6, %7, %cst {dimension_numbers = #tpu.dot_dimension_numbers<[1], [0], [0], [1], [0, 0, 1, 1], [], []>} : vector<16x64xf32>, vector<64x128xf32>, vector<16x128xf32> -> vector<16x128xf32>
    %9 = vector.extract_strided_slice %8 {offsets = [0, 0], sizes = [16, 32], strides = [1, 1]} : vector<16x128xf32> to vector<16x32xf32>
    %c64 = arith.constant 64 : index
    %c0_5 = arith.constant 0 : index
    %10 = vector.load %arg2[%c64, %c0_5] : memref<480x128xf32, #tpu.memory_space<vmem>>, vector<16x32xf32>
    %c64_6 = arith.constant 64 : index
    %c32 = arith.constant 32 : index
    %11 = vector.load %arg2[%c64_6, %c32] : memref<480x128xf32, #tpu.memory_space<vmem>>, vector<16x32xf32>
    %12 = tpu.iota {dimensions = array<i32: 0>} : vector<8x8xi32>
    %13 = tpu.iota {dimensions = array<i32: 1>} : vector<8x8xi32>
    %14 = arith.cmpi sle, %13, %12 : vector<8x8xi32>
    %15 = vector.shape_cast %14 : vector<8x8xi1> to vector<1x8x8xi1>
    %c0_i32 = arith.constant 0 : i32
    %16 = vector.broadcast %c0_i32 : i32 to vector<2x8xi32>
    %17 = arith.cmpi ne, %1, %16 : vector<2x8xi32>
    %18 = vector.shape_cast %17 : vector<2x8xi1> to vector<2x1x8xi1>
    %19 = vector.broadcast %15 : vector<1x8x8xi1> to vector<2x8x8xi1>
    %20 = vector.broadcast %18 : vector<2x1x8xi1> to vector<2x8x8xi1>
    %21 = arith.andi %19, %20 : vector<2x8x8xi1>
    %cst_7 = arith.constant 0.000000e+00 : f32
    %cst_8 = arith.constant -1.000000e+30 : f32
    %22 = vector.broadcast %cst_7 : f32 to vector<2x8x8xf32>
    %23 = vector.broadcast %cst_8 : f32 to vector<2x8x8xf32>
    %24 = arith.select %21, %22, %23 : vector<2x8x8xi1>, vector<2x8x8xf32>
    %25 = tpu.concatenate %24, %24, %24, %24 in 0 : vector<2x8x8xf32>, vector<2x8x8xf32>, vector<2x8x8xf32>, vector<2x8x8xf32> -> vector<8x8x8xf32>
    %c80 = arith.constant 80 : index
    %c0_9 = arith.constant 0 : index
    %26 = vector.load %arg2[%c80, %c0_9] : memref<480x128xf32, #tpu.memory_space<vmem>>, vector<1x32xf32>
    %27 = arith.mulf %9, %9 : vector<16x32xf32>
    %cst_10 = arith.constant dense<0.000000e+00> : vector<16xf32>
    %28 = vector.multi_reduction <add>, %27, %cst_10 [1] : vector<16x32xf32> to vector<16xf32>
    %29 = vector.shape_cast %28 : vector<16xf32> to vector<16x1xf32>
    %cst_11 = arith.constant 3.200000e+01 : f32
    %30 = vector.broadcast %cst_11 : f32 to vector<16x1xf32>
    %31 = arith.divf %29, %30 : vector<16x1xf32>
    %cst_12 = arith.constant 9.99999997E-7 : f32
    %32 = vector.broadcast %cst_12 : f32 to vector<16x1xf32>
    %33 = arith.addf %31, %32 : vector<16x1xf32>
    %34 = math.rsqrt %33 : vector<16x1xf32>
    %35 = vector.broadcast %34 : vector<16x1xf32> to vector<16x32xf32>
    %36 = arith.mulf %9, %35 : vector<16x32xf32>
    %37 = vector.broadcast %26 : vector<1x32xf32> to vector<16x32xf32>
    %38 = arith.mulf %36, %37 : vector<16x32xf32>
    %c96 = arith.constant 96 : index
    %c0_13 = arith.constant 0 : index
    %39 = vector.load %arg2[%c96, %c0_13] : memref<480x128xf32, #tpu.memory_space<vmem>>, vector<32x128xf32>
    %cst_14 = arith.constant dense<0.000000e+00> : vector<16x128xf32>
    %40 = tpu.matmul %38, %39, %cst_14 {dimension_numbers = #tpu.dot_dimension_numbers<[1], [0], [0], [1], [0, 0, 1, 1], [], []>} : vector<16x32xf32>, vector<32x128xf32>, vector<16x128xf32> -> vector<16x128xf32>
    %c88 = arith.constant 88 : index
    %c0_15 = arith.constant 0 : index
    %41 = vector.load %arg2[%c88, %c0_15] : memref<480x128xf32, #tpu.memory_space<vmem>>, vector<1x128xf32>
    %42 = vector.broadcast %41 : vector<1x128xf32> to vector<16x128xf32>
    %43 = arith.addf %40, %42 : vector<16x128xf32>
    %c160 = arith.constant 160 : index
    %c0_16 = arith.constant 0 : index
    %44 = vector.load %arg2[%c160, %c0_16] : memref<480x128xf32, #tpu.memory_space<vmem>>, vector<32x128xf32>
    %cst_17 = arith.constant dense<0.000000e+00> : vector<16x128xf32>
    %45 = tpu.matmul %38, %44, %cst_17 {dimension_numbers = #tpu.dot_dimension_numbers<[1], [0], [0], [1], [0, 0, 1, 1], [], []>} : vector<16x32xf32>, vector<32x128xf32>, vector<16x128xf32> -> vector<16x128xf32>
    %c90 = arith.constant 90 : index
    %c0_18 = arith.constant 0 : index
    %46 = vector.load %arg2[%c90, %c0_18] : memref<480x128xf32, #tpu.memory_space<vmem>>, vector<1x128xf32>
    %47 = vector.broadcast %46 : vector<1x128xf32> to vector<16x128xf32>
    %48 = arith.addf %45, %47 : vector<16x128xf32>
    %49 = vector.extract_strided_slice %43 {offsets = [0, 0], sizes = [16, 32], strides = [1, 1]} : vector<16x128xf32> to vector<16x32xf32>
    %50 = vector.extract_strided_slice %43 {offsets = [0, 32], sizes = [16, 32], strides = [1, 1]} : vector<16x128xf32> to vector<16x32xf32>
    %51 = vector.extract_strided_slice %43 {offsets = [0, 64], sizes = [16, 32], strides = [1, 1]} : vector<16x128xf32> to vector<16x32xf32>
    %52 = vector.extract_strided_slice %43 {offsets = [0, 96], sizes = [16, 32], strides = [1, 1]} : vector<16x128xf32> to vector<16x32xf32>
    %53 = vector.extract_strided_slice %48 {offsets = [0, 0], sizes = [16, 32], strides = [1, 1]} : vector<16x128xf32> to vector<16x32xf32>
    %54 = arith.mulf %49, %10 : vector<16x32xf32>
    %55 = arith.mulf %52, %11 : vector<16x32xf32>
    %56 = arith.addf %54, %55 : vector<16x32xf32>
    %57 = arith.mulf %50, %10 : vector<16x32xf32>
    %58 = arith.mulf %53, %11 : vector<16x32xf32>
    %59 = arith.addf %57, %58 : vector<16x32xf32>
    %60 = vector.shape_cast %56 : vector<16x32xf32> to vector<2x8x32xf32>
    %61 = vector.shape_cast %59 : vector<16x32xf32> to vector<2x8x32xf32>
    %62 = vector.shape_cast %51 : vector<16x32xf32> to vector<2x8x32xf32>
    %63 = vector.extract_strided_slice %60 {offsets = [0, 0, 0], sizes = [2, 8, 8], strides = [1, 1, 1]} : vector<2x8x32xf32> to vector<2x8x8xf32>
    %64 = vector.extract_strided_slice %60 {offsets = [0, 0, 8], sizes = [2, 8, 8], strides = [1, 1, 1]} : vector<2x8x32xf32> to vector<2x8x8xf32>
    %65 = vector.extract_strided_slice %60 {offsets = [0, 0, 16], sizes = [2, 8, 8], strides = [1, 1, 1]} : vector<2x8x32xf32> to vector<2x8x8xf32>
    %66 = vector.extract_strided_slice %60 {offsets = [0, 0, 24], sizes = [2, 8, 8], strides = [1, 1, 1]} : vector<2x8x32xf32> to vector<2x8x8xf32>
    %67 = tpu.concatenate %63, %64, %65, %66 in 0 : vector<2x8x8xf32>, vector<2x8x8xf32>, vector<2x8x8xf32>, vector<2x8x8xf32> -> vector<8x8x8xf32>
    %68 = vector.extract_strided_slice %61 {offsets = [0, 0, 0], sizes = [2, 8, 8], strides = [1, 1, 1]} : vector<2x8x32xf32> to vector<2x8x8xf32>
    %69 = vector.extract_strided_slice %61 {offsets = [0, 0, 8], sizes = [2, 8, 8], strides = [1, 1, 1]} : vector<2x8x32xf32> to vector<2x8x8xf32>
    %70 = vector.extract_strided_slice %61 {offsets = [0, 0, 16], sizes = [2, 8, 8], strides = [1, 1, 1]} : vector<2x8x32xf32> to vector<2x8x8xf32>
    %71 = vector.extract_strided_slice %61 {offsets = [0, 0, 24], sizes = [2, 8, 8], strides = [1, 1, 1]} : vector<2x8x32xf32> to vector<2x8x8xf32>
    %72 = tpu.concatenate %68, %69, %70, %71 in 0 : vector<2x8x8xf32>, vector<2x8x8xf32>, vector<2x8x8xf32>, vector<2x8x8xf32> -> vector<8x8x8xf32>
    %73 = vector.extract_strided_slice %62 {offsets = [0, 0, 0], sizes = [2, 8, 8], strides = [1, 1, 1]} : vector<2x8x32xf32> to vector<2x8x8xf32>
    %74 = vector.extract_strided_slice %62 {offsets = [0, 0, 8], sizes = [2, 8, 8], strides = [1, 1, 1]} : vector<2x8x32xf32> to vector<2x8x8xf32>
    %75 = vector.extract_strided_slice %62 {offsets = [0, 0, 16], sizes = [2, 8, 8], strides = [1, 1, 1]} : vector<2x8x32xf32> to vector<2x8x8xf32>
    %76 = vector.extract_strided_slice %62 {offsets = [0, 0, 24], sizes = [2, 8, 8], strides = [1, 1, 1]} : vector<2x8x32xf32> to vector<2x8x8xf32>
    %77 = tpu.concatenate %73, %74, %75, %76 in 0 : vector<2x8x8xf32>, vector<2x8x8xf32>, vector<2x8x8xf32>, vector<2x8x8xf32> -> vector<8x8x8xf32>
    "tpu.trace_start"() <{level = 10 : i32, message = "nqd,nkd->nqk"}> : () -> ()
    %cst_19 = arith.constant dense<0.000000e+00> : vector<8x8x8xf32>
    %78 = tpu.matmul %67, %72, %cst_19 {dimension_numbers = #tpu.dot_dimension_numbers<[2], [2], [1], [1], [0, 0, 0, 1, 1, 1], [0], [0]>} : vector<8x8x8xf32>, vector<8x8x8xf32>, vector<8x8x8xf32> -> vector<8x8x8xf32>
    "tpu.trace_stop"() : () -> ()
    %79 = arith.addf %78, %25 : vector<8x8x8xf32>
    %cst_20 = arith.constant dense<0xFF800000> : vector<8x8xf32>
    %80 = vector.multi_reduction <maximumf>, %79, %cst_20 [2] : vector<8x8x8xf32> to vector<8x8xf32>
    %81 = vector.shape_cast %80 : vector<8x8xf32> to vector<8x8x1xf32>
    %82 = vector.broadcast %81 : vector<8x8x1xf32> to vector<8x8x8xf32>
    %83 = arith.subf %79, %82 : vector<8x8x8xf32>
    %84 = math.exp %83 : vector<8x8x8xf32>
    %cst_21 = arith.constant dense<0.000000e+00> : vector<8x8xf32>
    %85 = vector.multi_reduction <add>, %84, %cst_21 [2] : vector<8x8x8xf32> to vector<8x8xf32>
    %86 = vector.shape_cast %85 : vector<8x8xf32> to vector<8x8x1xf32>
    %87 = vector.broadcast %86 : vector<8x8x1xf32> to vector<8x8x8xf32>
    %88 = arith.divf %84, %87 : vector<8x8x8xf32>
    "tpu.trace_start"() <{level = 10 : i32, message = "nqk,nkd->nqd"}> : () -> ()
    %cst_22 = arith.constant dense<0.000000e+00> : vector<8x8x8xf32>
    %89 = tpu.matmul %88, %77, %cst_22 {dimension_numbers = #tpu.dot_dimension_numbers<[2], [1], [1], [2], [0, 0, 0, 1, 1, 2], [0], [0]>} : vector<8x8x8xf32>, vector<8x8x8xf32>, vector<8x8x8xf32> -> vector<8x8x8xf32>
    "tpu.trace_stop"() : () -> ()
    %90 = vector.extract_strided_slice %89 {offsets = [0, 0, 0], sizes = [2, 8, 8], strides = [1, 1, 1]} : vector<8x8x8xf32> to vector<2x8x8xf32>
    %91 = vector.extract_strided_slice %89 {offsets = [2, 0, 0], sizes = [2, 8, 8], strides = [1, 1, 1]} : vector<8x8x8xf32> to vector<2x8x8xf32>
    %92 = vector.extract_strided_slice %89 {offsets = [4, 0, 0], sizes = [2, 8, 8], strides = [1, 1, 1]} : vector<8x8x8xf32> to vector<2x8x8xf32>
    %93 = vector.extract_strided_slice %89 {offsets = [6, 0, 0], sizes = [2, 8, 8], strides = [1, 1, 1]} : vector<8x8x8xf32> to vector<2x8x8xf32>
    %94 = tpu.concatenate %90, %91, %92, %93 in 2 : vector<2x8x8xf32>, vector<2x8x8xf32>, vector<2x8x8xf32>, vector<2x8x8xf32> -> vector<2x8x32xf32>
    %95 = vector.shape_cast %94 : vector<2x8x32xf32> to vector<16x32xf32>
    %c224 = arith.constant 224 : index
    %c0_23 = arith.constant 0 : index
    %96 = vector.load %arg2[%c224, %c0_23] : memref<480x128xf32, #tpu.memory_space<vmem>>, vector<32x128xf32>
    %cst_24 = arith.constant dense<0.000000e+00> : vector<16x128xf32>
    %97 = tpu.matmul %95, %96, %cst_24 {dimension_numbers = #tpu.dot_dimension_numbers<[1], [0], [0], [1], [0, 0, 1, 1], [], []>} : vector<16x32xf32>, vector<32x128xf32>, vector<16x128xf32> -> vector<16x128xf32>
    %98 = vector.extract_strided_slice %97 {offsets = [0, 0], sizes = [16, 32], strides = [1, 1]} : vector<16x128xf32> to vector<16x32xf32>
    %99 = arith.addf %9, %98 : vector<16x32xf32>
    %c82 = arith.constant 82 : index
    %c0_25 = arith.constant 0 : index
    %100 = vector.load %arg2[%c82, %c0_25] : memref<480x128xf32, #tpu.memory_space<vmem>>, vector<1x32xf32>
    %101 = arith.mulf %99, %99 : vector<16x32xf32>
    %cst_26 = arith.constant dense<0.000000e+00> : vector<16xf32>
    %102 = vector.multi_reduction <add>, %101, %cst_26 [1] : vector<16x32xf32> to vector<16xf32>
    %103 = vector.shape_cast %102 : vector<16xf32> to vector<16x1xf32>
    %cst_27 = arith.constant 3.200000e+01 : f32
    %104 = vector.broadcast %cst_27 : f32 to vector<16x1xf32>
    %105 = arith.divf %103, %104 : vector<16x1xf32>
    %cst_28 = arith.constant 9.99999997E-7 : f32
    %106 = vector.broadcast %cst_28 : f32 to vector<16x1xf32>
    %107 = arith.addf %105, %106 : vector<16x1xf32>
    %108 = math.rsqrt %107 : vector<16x1xf32>
    %109 = vector.broadcast %108 : vector<16x1xf32> to vector<16x32xf32>
    %110 = arith.mulf %99, %109 : vector<16x32xf32>
    %111 = vector.broadcast %100 : vector<1x32xf32> to vector<16x32xf32>
    %112 = arith.mulf %110, %111 : vector<16x32xf32>
    %c288 = arith.constant 288 : index
    %c0_29 = arith.constant 0 : index
    %113 = vector.load %arg2[%c288, %c0_29] : memref<480x128xf32, #tpu.memory_space<vmem>>, vector<32x128xf32>
    %cst_30 = arith.constant dense<0.000000e+00> : vector<16x128xf32>
    %114 = tpu.matmul %112, %113, %cst_30 {dimension_numbers = #tpu.dot_dimension_numbers<[1], [0], [0], [1], [0, 0, 1, 1], [], []>} : vector<16x32xf32>, vector<32x128xf32>, vector<16x128xf32> -> vector<16x128xf32>
    %115 = vector.extract_strided_slice %114 {offsets = [0, 0], sizes = [16, 64], strides = [1, 1]} : vector<16x128xf32> to vector<16x64xf32>
    %116 = vector.extract_strided_slice %114 {offsets = [0, 64], sizes = [16, 64], strides = [1, 1]} : vector<16x128xf32> to vector<16x64xf32>
    %117 = arith.negf %115 : vector<16x64xf32>
    %118 = math.exp %117 : vector<16x64xf32>
    %cst_31 = arith.constant 1.000000e+00 : f32
    %119 = vector.broadcast %cst_31 : f32 to vector<16x64xf32>
    %120 = arith.addf %119, %118 : vector<16x64xf32>
    %121 = arith.divf %119, %120 : vector<16x64xf32>
    %122 = arith.mulf %115, %121 : vector<16x64xf32>
    %123 = arith.mulf %122, %116 : vector<16x64xf32>
    %c352 = arith.constant 352 : index
    %c0_32 = arith.constant 0 : index
    %124 = vector.load %arg2[%c352, %c0_32] : memref<480x128xf32, #tpu.memory_space<vmem>>, vector<64x128xf32>
    %cst_33 = arith.constant dense<0.000000e+00> : vector<16x128xf32>
    %125 = tpu.matmul %123, %124, %cst_33 {dimension_numbers = #tpu.dot_dimension_numbers<[1], [0], [0], [1], [0, 0, 1, 1], [], []>} : vector<16x64xf32>, vector<64x128xf32>, vector<16x128xf32> -> vector<16x128xf32>
    %126 = vector.extract_strided_slice %125 {offsets = [0, 0], sizes = [16, 32], strides = [1, 1]} : vector<16x128xf32> to vector<16x32xf32>
    %127 = arith.addf %99, %126 : vector<16x32xf32>
    %c81 = arith.constant 81 : index
    %c0_34 = arith.constant 0 : index
    %128 = vector.load %arg2[%c81, %c0_34] : memref<480x128xf32, #tpu.memory_space<vmem>>, vector<1x32xf32>
    %129 = arith.mulf %127, %127 : vector<16x32xf32>
    %cst_35 = arith.constant dense<0.000000e+00> : vector<16xf32>
    %130 = vector.multi_reduction <add>, %129, %cst_35 [1] : vector<16x32xf32> to vector<16xf32>
    %131 = vector.shape_cast %130 : vector<16xf32> to vector<16x1xf32>
    %cst_36 = arith.constant 3.200000e+01 : f32
    %132 = vector.broadcast %cst_36 : f32 to vector<16x1xf32>
    %133 = arith.divf %131, %132 : vector<16x1xf32>
    %cst_37 = arith.constant 9.99999997E-7 : f32
    %134 = vector.broadcast %cst_37 : f32 to vector<16x1xf32>
    %135 = arith.addf %133, %134 : vector<16x1xf32>
    %136 = math.rsqrt %135 : vector<16x1xf32>
    %137 = vector.broadcast %136 : vector<16x1xf32> to vector<16x32xf32>
    %138 = arith.mulf %127, %137 : vector<16x32xf32>
    %139 = vector.broadcast %128 : vector<1x32xf32> to vector<16x32xf32>
    %140 = arith.mulf %138, %139 : vector<16x32xf32>
    %c128 = arith.constant 128 : index
    %c0_38 = arith.constant 0 : index
    %141 = vector.load %arg2[%c128, %c0_38] : memref<480x128xf32, #tpu.memory_space<vmem>>, vector<32x128xf32>
    %cst_39 = arith.constant dense<0.000000e+00> : vector<16x128xf32>
    %142 = tpu.matmul %140, %141, %cst_39 {dimension_numbers = #tpu.dot_dimension_numbers<[1], [0], [0], [1], [0, 0, 1, 1], [], []>} : vector<16x32xf32>, vector<32x128xf32>, vector<16x128xf32> -> vector<16x128xf32>
    %c89 = arith.constant 89 : index
    %c0_40 = arith.constant 0 : index
    %143 = vector.load %arg2[%c89, %c0_40] : memref<480x128xf32, #tpu.memory_space<vmem>>, vector<1x128xf32>
    %144 = vector.broadcast %143 : vector<1x128xf32> to vector<16x128xf32>
    %145 = arith.addf %142, %144 : vector<16x128xf32>
    %c192 = arith.constant 192 : index
    %c0_41 = arith.constant 0 : index
    %146 = vector.load %arg2[%c192, %c0_41] : memref<480x128xf32, #tpu.memory_space<vmem>>, vector<32x128xf32>
    %cst_42 = arith.constant dense<0.000000e+00> : vector<16x128xf32>
    %147 = tpu.matmul %140, %146, %cst_42 {dimension_numbers = #tpu.dot_dimension_numbers<[1], [0], [0], [1], [0, 0, 1, 1], [], []>} : vector<16x32xf32>, vector<32x128xf32>, vector<16x128xf32> -> vector<16x128xf32>
    %c91 = arith.constant 91 : index
    %c0_43 = arith.constant 0 : index
    %148 = vector.load %arg2[%c91, %c0_43] : memref<480x128xf32, #tpu.memory_space<vmem>>, vector<1x128xf32>
    %149 = vector.broadcast %148 : vector<1x128xf32> to vector<16x128xf32>
    %150 = arith.addf %147, %149 : vector<16x128xf32>
    %151 = vector.extract_strided_slice %145 {offsets = [0, 0], sizes = [16, 32], strides = [1, 1]} : vector<16x128xf32> to vector<16x32xf32>
    %152 = vector.extract_strided_slice %145 {offsets = [0, 32], sizes = [16, 32], strides = [1, 1]} : vector<16x128xf32> to vector<16x32xf32>
    %153 = vector.extract_strided_slice %145 {offsets = [0, 64], sizes = [16, 32], strides = [1, 1]} : vector<16x128xf32> to vector<16x32xf32>
    %154 = vector.extract_strided_slice %145 {offsets = [0, 96], sizes = [16, 32], strides = [1, 1]} : vector<16x128xf32> to vector<16x32xf32>
    %155 = vector.extract_strided_slice %150 {offsets = [0, 0], sizes = [16, 32], strides = [1, 1]} : vector<16x128xf32> to vector<16x32xf32>
    %156 = arith.mulf %151, %10 : vector<16x32xf32>
    %157 = arith.mulf %154, %11 : vector<16x32xf32>
    %158 = arith.addf %156, %157 : vector<16x32xf32>
    %159 = arith.mulf %152, %10 : vector<16x32xf32>
    %160 = arith.mulf %155, %11 : vector<16x32xf32>
    %161 = arith.addf %159, %160 : vector<16x32xf32>
    %162 = vector.shape_cast %158 : vector<16x32xf32> to vector<2x8x32xf32>
    %163 = vector.shape_cast %161 : vector<16x32xf32> to vector<2x8x32xf32>
    %164 = vector.shape_cast %153 : vector<16x32xf32> to vector<2x8x32xf32>
    %165 = vector.extract_strided_slice %162 {offsets = [0, 0, 0], sizes = [2, 8, 8], strides = [1, 1, 1]} : vector<2x8x32xf32> to vector<2x8x8xf32>
    %166 = vector.extract_strided_slice %162 {offsets = [0, 0, 8], sizes = [2, 8, 8], strides = [1, 1, 1]} : vector<2x8x32xf32> to vector<2x8x8xf32>
    %167 = vector.extract_strided_slice %162 {offsets = [0, 0, 16], sizes = [2, 8, 8], strides = [1, 1, 1]} : vector<2x8x32xf32> to vector<2x8x8xf32>
    %168 = vector.extract_strided_slice %162 {offsets = [0, 0, 24], sizes = [2, 8, 8], strides = [1, 1, 1]} : vector<2x8x32xf32> to vector<2x8x8xf32>
    %169 = tpu.concatenate %165, %166, %167, %168 in 0 : vector<2x8x8xf32>, vector<2x8x8xf32>, vector<2x8x8xf32>, vector<2x8x8xf32> -> vector<8x8x8xf32>
    %170 = vector.extract_strided_slice %163 {offsets = [0, 0, 0], sizes = [2, 8, 8], strides = [1, 1, 1]} : vector<2x8x32xf32> to vector<2x8x8xf32>
    %171 = vector.extract_strided_slice %163 {offsets = [0, 0, 8], sizes = [2, 8, 8], strides = [1, 1, 1]} : vector<2x8x32xf32> to vector<2x8x8xf32>
    %172 = vector.extract_strided_slice %163 {offsets = [0, 0, 16], sizes = [2, 8, 8], strides = [1, 1, 1]} : vector<2x8x32xf32> to vector<2x8x8xf32>
    %173 = vector.extract_strided_slice %163 {offsets = [0, 0, 24], sizes = [2, 8, 8], strides = [1, 1, 1]} : vector<2x8x32xf32> to vector<2x8x8xf32>
    %174 = tpu.concatenate %170, %171, %172, %173 in 0 : vector<2x8x8xf32>, vector<2x8x8xf32>, vector<2x8x8xf32>, vector<2x8x8xf32> -> vector<8x8x8xf32>
    %175 = vector.extract_strided_slice %164 {offsets = [0, 0, 0], sizes = [2, 8, 8], strides = [1, 1, 1]} : vector<2x8x32xf32> to vector<2x8x8xf32>
    %176 = vector.extract_strided_slice %164 {offsets = [0, 0, 8], sizes = [2, 8, 8], strides = [1, 1, 1]} : vector<2x8x32xf32> to vector<2x8x8xf32>
    %177 = vector.extract_strided_slice %164 {offsets = [0, 0, 16], sizes = [2, 8, 8], strides = [1, 1, 1]} : vector<2x8x32xf32> to vector<2x8x8xf32>
    %178 = vector.extract_strided_slice %164 {offsets = [0, 0, 24], sizes = [2, 8, 8], strides = [1, 1, 1]} : vector<2x8x32xf32> to vector<2x8x8xf32>
    %179 = tpu.concatenate %175, %176, %177, %178 in 0 : vector<2x8x8xf32>, vector<2x8x8xf32>, vector<2x8x8xf32>, vector<2x8x8xf32> -> vector<8x8x8xf32>
    "tpu.trace_start"() <{level = 10 : i32, message = "nqd,nkd->nqk"}> : () -> ()
    %cst_44 = arith.constant dense<0.000000e+00> : vector<8x8x8xf32>
    %180 = tpu.matmul %169, %174, %cst_44 {dimension_numbers = #tpu.dot_dimension_numbers<[2], [2], [1], [1], [0, 0, 0, 1, 1, 1], [0], [0]>} : vector<8x8x8xf32>, vector<8x8x8xf32>, vector<8x8x8xf32> -> vector<8x8x8xf32>
    "tpu.trace_stop"() : () -> ()
    %181 = arith.addf %180, %25 : vector<8x8x8xf32>
    %cst_45 = arith.constant dense<0xFF800000> : vector<8x8xf32>
    %182 = vector.multi_reduction <maximumf>, %181, %cst_45 [2] : vector<8x8x8xf32> to vector<8x8xf32>
    %183 = vector.shape_cast %182 : vector<8x8xf32> to vector<8x8x1xf32>
    %184 = vector.broadcast %183 : vector<8x8x1xf32> to vector<8x8x8xf32>
    %185 = arith.subf %181, %184 : vector<8x8x8xf32>
    %186 = math.exp %185 : vector<8x8x8xf32>
    %cst_46 = arith.constant dense<0.000000e+00> : vector<8x8xf32>
    %187 = vector.multi_reduction <add>, %186, %cst_46 [2] : vector<8x8x8xf32> to vector<8x8xf32>
    %188 = vector.shape_cast %187 : vector<8x8xf32> to vector<8x8x1xf32>
    %189 = vector.broadcast %188 : vector<8x8x1xf32> to vector<8x8x8xf32>
    %190 = arith.divf %186, %189 : vector<8x8x8xf32>
    "tpu.trace_start"() <{level = 10 : i32, message = "nqk,nkd->nqd"}> : () -> ()
    %cst_47 = arith.constant dense<0.000000e+00> : vector<8x8x8xf32>
    %191 = tpu.matmul %190, %179, %cst_47 {dimension_numbers = #tpu.dot_dimension_numbers<[2], [1], [1], [2], [0, 0, 0, 1, 1, 2], [0], [0]>} : vector<8x8x8xf32>, vector<8x8x8xf32>, vector<8x8x8xf32> -> vector<8x8x8xf32>
    "tpu.trace_stop"() : () -> ()
    %192 = vector.extract_strided_slice %191 {offsets = [0, 0, 0], sizes = [2, 8, 8], strides = [1, 1, 1]} : vector<8x8x8xf32> to vector<2x8x8xf32>
    %193 = vector.extract_strided_slice %191 {offsets = [2, 0, 0], sizes = [2, 8, 8], strides = [1, 1, 1]} : vector<8x8x8xf32> to vector<2x8x8xf32>
    %194 = vector.extract_strided_slice %191 {offsets = [4, 0, 0], sizes = [2, 8, 8], strides = [1, 1, 1]} : vector<8x8x8xf32> to vector<2x8x8xf32>
    %195 = vector.extract_strided_slice %191 {offsets = [6, 0, 0], sizes = [2, 8, 8], strides = [1, 1, 1]} : vector<8x8x8xf32> to vector<2x8x8xf32>
    %196 = tpu.concatenate %192, %193, %194, %195 in 2 : vector<2x8x8xf32>, vector<2x8x8xf32>, vector<2x8x8xf32>, vector<2x8x8xf32> -> vector<2x8x32xf32>
    %197 = vector.shape_cast %196 : vector<2x8x32xf32> to vector<16x32xf32>
    %c256 = arith.constant 256 : index
    %c0_48 = arith.constant 0 : index
    %198 = vector.load %arg2[%c256, %c0_48] : memref<480x128xf32, #tpu.memory_space<vmem>>, vector<32x128xf32>
    %cst_49 = arith.constant dense<0.000000e+00> : vector<16x128xf32>
    %199 = tpu.matmul %197, %198, %cst_49 {dimension_numbers = #tpu.dot_dimension_numbers<[1], [0], [0], [1], [0, 0, 1, 1], [], []>} : vector<16x32xf32>, vector<32x128xf32>, vector<16x128xf32> -> vector<16x128xf32>
    %200 = vector.extract_strided_slice %199 {offsets = [0, 0], sizes = [16, 32], strides = [1, 1]} : vector<16x128xf32> to vector<16x32xf32>
    %201 = arith.addf %127, %200 : vector<16x32xf32>
    %c83 = arith.constant 83 : index
    %c0_50 = arith.constant 0 : index
    %202 = vector.load %arg2[%c83, %c0_50] : memref<480x128xf32, #tpu.memory_space<vmem>>, vector<1x32xf32>
    %203 = arith.mulf %201, %201 : vector<16x32xf32>
    %cst_51 = arith.constant dense<0.000000e+00> : vector<16xf32>
    %204 = vector.multi_reduction <add>, %203, %cst_51 [1] : vector<16x32xf32> to vector<16xf32>
    %205 = vector.shape_cast %204 : vector<16xf32> to vector<16x1xf32>
    %cst_52 = arith.constant 3.200000e+01 : f32
    %206 = vector.broadcast %cst_52 : f32 to vector<16x1xf32>
    %207 = arith.divf %205, %206 : vector<16x1xf32>
    %cst_53 = arith.constant 9.99999997E-7 : f32
    %208 = vector.broadcast %cst_53 : f32 to vector<16x1xf32>
    %209 = arith.addf %207, %208 : vector<16x1xf32>
    %210 = math.rsqrt %209 : vector<16x1xf32>
    %211 = vector.broadcast %210 : vector<16x1xf32> to vector<16x32xf32>
    %212 = arith.mulf %201, %211 : vector<16x32xf32>
    %213 = vector.broadcast %202 : vector<1x32xf32> to vector<16x32xf32>
    %214 = arith.mulf %212, %213 : vector<16x32xf32>
    %c320 = arith.constant 320 : index
    %c0_54 = arith.constant 0 : index
    %215 = vector.load %arg2[%c320, %c0_54] : memref<480x128xf32, #tpu.memory_space<vmem>>, vector<32x128xf32>
    %cst_55 = arith.constant dense<0.000000e+00> : vector<16x128xf32>
    %216 = tpu.matmul %214, %215, %cst_55 {dimension_numbers = #tpu.dot_dimension_numbers<[1], [0], [0], [1], [0, 0, 1, 1], [], []>} : vector<16x32xf32>, vector<32x128xf32>, vector<16x128xf32> -> vector<16x128xf32>
    %217 = vector.extract_strided_slice %216 {offsets = [0, 0], sizes = [16, 64], strides = [1, 1]} : vector<16x128xf32> to vector<16x64xf32>
    %218 = vector.extract_strided_slice %216 {offsets = [0, 64], sizes = [16, 64], strides = [1, 1]} : vector<16x128xf32> to vector<16x64xf32>
    %219 = arith.negf %217 : vector<16x64xf32>
    %220 = math.exp %219 : vector<16x64xf32>
    %cst_56 = arith.constant 1.000000e+00 : f32
    %221 = vector.broadcast %cst_56 : f32 to vector<16x64xf32>
    %222 = arith.addf %221, %220 : vector<16x64xf32>
    %223 = arith.divf %221, %222 : vector<16x64xf32>
    %224 = arith.mulf %217, %223 : vector<16x64xf32>
    %225 = arith.mulf %224, %218 : vector<16x64xf32>
    %c416 = arith.constant 416 : index
    %c0_57 = arith.constant 0 : index
    %226 = vector.load %arg2[%c416, %c0_57] : memref<480x128xf32, #tpu.memory_space<vmem>>, vector<64x128xf32>
    %cst_58 = arith.constant dense<0.000000e+00> : vector<16x128xf32>
    %227 = tpu.matmul %225, %226, %cst_58 {dimension_numbers = #tpu.dot_dimension_numbers<[1], [0], [0], [1], [0, 0, 1, 1], [], []>} : vector<16x64xf32>, vector<64x128xf32>, vector<16x128xf32> -> vector<16x128xf32>
    %228 = vector.extract_strided_slice %227 {offsets = [0, 0], sizes = [16, 32], strides = [1, 1]} : vector<16x128xf32> to vector<16x32xf32>
    %229 = arith.addf %201, %228 : vector<16x32xf32>
    %c84 = arith.constant 84 : index
    %c0_59 = arith.constant 0 : index
    %230 = vector.load %arg2[%c84, %c0_59] : memref<480x128xf32, #tpu.memory_space<vmem>>, vector<1x32xf32>
    %231 = arith.mulf %229, %229 : vector<16x32xf32>
    %cst_60 = arith.constant dense<0.000000e+00> : vector<16xf32>
    %232 = vector.multi_reduction <add>, %231, %cst_60 [1] : vector<16x32xf32> to vector<16xf32>
    %233 = vector.shape_cast %232 : vector<16xf32> to vector<16x1xf32>
    %cst_61 = arith.constant 3.200000e+01 : f32
    %234 = vector.broadcast %cst_61 : f32 to vector<16x1xf32>
    %235 = arith.divf %233, %234 : vector<16x1xf32>
    %cst_62 = arith.constant 9.99999997E-7 : f32
    %236 = vector.broadcast %cst_62 : f32 to vector<16x1xf32>
    %237 = arith.addf %235, %236 : vector<16x1xf32>
    %238 = math.rsqrt %237 : vector<16x1xf32>
    %239 = vector.broadcast %238 : vector<16x1xf32> to vector<16x32xf32>
    %240 = arith.mulf %229, %239 : vector<16x32xf32>
    %241 = vector.broadcast %230 : vector<1x32xf32> to vector<16x32xf32>
    %242 = arith.mulf %240, %241 : vector<16x32xf32>
    %c85 = arith.constant 85 : index
    %c0_63 = arith.constant 0 : index
    %243 = vector.load %arg2[%c85, %c0_63] : memref<480x128xf32, #tpu.memory_space<vmem>>, vector<1x32xf32>
    %244 = vector.shape_cast %242 : vector<16x32xf32> to vector<2x8x32xf32>
    %245 = vector.shape_cast %243 : vector<1x32xf32> to vector<1x1x32xf32>
    %246 = vector.broadcast %245 : vector<1x1x32xf32> to vector<2x8x32xf32>
    %247 = arith.mulf %244, %246 : vector<2x8x32xf32>
    %cst_64 = arith.constant dense<0.000000e+00> : vector<2x8xf32>
    %248 = vector.multi_reduction <add>, %247, %cst_64 [2] : vector<2x8x32xf32> to vector<2x8xf32>
    %cst_65 = arith.constant dense<0> : vector<2xi32>
    %249 = vector.multi_reduction <add>, %1, %cst_65 [1] : vector<2x8xi32> to vector<2xi32>
    %250 = vector.shape_cast %249 : vector<2xi32> to vector<2x1xi32>
    %c0_i32_66 = arith.constant 0 : i32
    %251 = vector.broadcast %c0_i32_66 : i32 to vector<2x1xi32>
    %252 = arith.cmpi sgt, %250, %251 : vector<2x1xi32>
    %c1_i32 = arith.constant 1 : i32
    %253 = vector.broadcast %c1_i32 : i32 to vector<2x1xi32>
    %254 = arith.subi %250, %253 : vector<2x1xi32>
    %c7_i32 = arith.constant 7 : i32
    %255 = vector.broadcast %c7_i32 : i32 to vector<2x1xi32>
    %256 = arith.select %252, %254, %255 : vector<2x1xi1>, vector<2x1xi32>
    %257 = tpu.iota {dimensions = array<i32: 1>} : vector<2x8xi32>
    %258 = vector.broadcast %256 : vector<2x1xi32> to vector<2x8xi32>
    %259 = arith.cmpi eq, %257, %258 : vector<2x8xi32>
    %cst_67 = arith.constant 0.000000e+00 : f32
    %260 = vector.broadcast %cst_67 : f32 to vector<2x8xf32>
    %261 = arith.select %259, %248, %260 : vector<2x8xi1>, vector<2x8xf32>
    %cst_68 = arith.constant dense<0.000000e+00> : vector<2xf32>
    %262 = vector.multi_reduction <add>, %261, %cst_68 [1] : vector<2x8xf32> to vector<2xf32>
    %263 = vector.shape_cast %262 : vector<2xf32> to vector<2x1xf32>
    %c0_69 = arith.constant 0 : index
    %c0_70 = arith.constant 0 : index
    %264 = vector.load %arg3[%c0_69, %c0_70] : memref<2x1xf32, #tpu.memory_space<vmem>>, vector<2x1xf32>
    tpu.vector_store %arg3[%c0_69, %c0_70], %263 {strides = array<i32>} : memref<2x1xf32, #tpu.memory_space<vmem>>, vector<2x1xf32>,
    return
  }
}

</mosaic_0001>

<bundles_post_ra>
// kernel: reward_model_forward.1
= control target key start
LH: loop header
LB: loop body
LE: loop exit
PB: predicated region body
PF: predicated region fallthrough
CT: control target
= control target key end

     0   :  { %8 = vsyncpa [#allocation3], 0  ;;  %s4899_s12 = smov [#allocation2]   ;;  %s5502_s0 = inlined_call_operand.vmem [shape: s32[16,1], index: 0, kind: input, shape index: {}]   ;;  %s5503_s1 = inlined_call_operand.vmem [shape: s32[2,8], index: 1, kind: input, shape index: {}]   ;;  %s5504_s2 = inlined_call_operand.hbm [shape: f32[480,128], index: 2, kind: input, shape index: {}]   ;;  %s5505_s3 = inlined_call_operand.vmem [shape: f32[2,1], index: 3, kind: output, shape index: {}]  }
   0x1   :  { %s18_s13 = sshll.u32 %s4899_s12, 4  ;;  %s4875_s16 = scalar_lea.hbm %s5504_s2, 7680  ;;  %s19_s13 = int_to_ptr.vmem [resolvable:$true] %s18_s13 }
   0x2   :  { %p4876_p0 = scmp.ne.s32.totalorder %s5504_s2, %s4875_s16  ;;  %p4879_p1 = scmp.lt.u32.totalorder %s4875_s16, %s5504_s2 }
   0x4   :  { %p4881_p2 = pnand %p4879_p1, %p4876_p0 }
   0x6   :  { %4884 = shalt.err (!%p4881_p2)
}
   0x7   :  { %s4885_s21 = scalar_lea.vmem %s19_s13, 7680  ;;  %p4890_p4 = scmp.lt.s32.totalorder %s19_s13, %s19_s13 }
   0x8   :  { %p4886_p3 = scmp.ne.s32.totalorder %s19_s13, %s4885_s21  ;;  %p4891_p5 = scmp.lt.s32.totalorder %s4885_s21, %s4885_s21 }
   0xa   :  { %p4892_p6 = por %p4891_p5, %p4890_p4 }
   0xc   :  { %p4893_p7 = pnand %p4892_p6, %p4886_p3 }
   0xe   :  { %4896 = shalt.err (!%p4893_p7)
}
   0xf   :  { %s4900_s22 = smov 128   ;;  %s4901_s23 = smov 8  }
  0x10   :  { %24 = dma.hbm_to_vmem [thread:$0]  %s5504_s2, 7680, %s19_s13, [#allocation3], %s4900_s22, %s4900_s22, %s4901_s23  }
  0x11   :  { %4897 = dma.done.wait [#allocation3], 7680  }
  0x12   :  { %4898 = vsyncadd [#allocation3], 4294959616  ;;  %v4902_v0 = vmov 0   ;;  %v28_v1 = vld [vmem:[%s5502_s0] sm:$0xff]  ;;  %v46_v3 = vld [vmem:[#allocation2 + $0x8] sm:$0xff]  ;;  %v4903_v15 = vmov 0.0   ;;  %v31_v16 = vlaneseq }
  0x13   :  { %4771 = vset.pattern.permute.xlu0 %v4902_v0  ;;  %v45_v2 = vld [vmem:[#allocation2] sm:$0xff]  ;;  %v47_v4 = vld [vmem:[#allocation2 + $0x10] sm:$0xff]  ;;  %v29_v5 = vld [vmem:[%s5502_s0 + $0x8] sm:$0xff]  ;;  %vm53_vm0 = vcmask 523264   ;;  %vm187_vm3 = vcmask 261120   ;;  %s4904_s0 = smov 96  }
  0x14   :  { %34 = vperm.xlu0 %4771, %v28_v1   ;;  %v4643_v6 = vpack.c.bf16 %v46_v3, %v45_v2  ;;  %v48_v7 = vld [vmem:[#allocation2 + $0x18] sm:$0xff]  ;;  %v49_v9 = vld [vmem:[#allocation2 + $0x20] sm:$0xff]  ;;  %v50_v10 = vld [vmem:[#allocation2 + $0x28] sm:$0xff]  ;;  %v4957_v17 = vand.u32 127, %v31_v16  ;;  %s4905_s2 = smov 32   ;;  %s4906_s30 = smov 64  }
  0x15   :  { %v4647_v8 = vpack.c.bf16 %v48_v7, %v47_v4  ;;  %v4651_v11 = vpack.c.bf16 %v50_v10, %v49_v9  ;;  %v51_v12 = vld [vmem:[#allocation2 + $0x30] sm:$0xff]  ;;  %v52_v13 = vld [vmem:[#allocation2 + $0x38] sm:$0xff]  ;;  %v209_v28 = vld [vmem:[#allocation2 + $0x60] sm:$0xff]  ;;  %s4907_s4 = smov 120   ;;  %vm4908_vm4 = vmmov 0   ;;  %s4909_s5 = smov 112  }
  0x16   :  { %4644 = vmatprep.subr.bf16.mxu0 %v4643_v6  ;;  %v4655_v14 = vpack.c.bf16 %v52_v13, %v51_v12  ;;  %v210_v29 = vld [vmem:[#allocation2 + $0x68] sm:$0xff]  ;;  %v211_v30 = vld [vmem:[#allocation2 + $0x70] sm:$0xff]  ;;  %v212_v32 = vld [vmem:[#allocation2 + $0x78] sm:$0xff]  ;;  %s4910_s6 = smov 104   ;;  %vm475_vm5 = vcmask 64512   ;;  %s4913_s9 = smov 16  }
  0x17   :  { %4646 = vmatpush3.bf16.msra.mxu0 %v4643_v6  ;;  %v4659_v31 = vpack.c.bf16 %v210_v29, %v209_v28  ;;  %v4663_v33 = vpack.c.bf16 %v212_v32, %v211_v30  ;;  %v299_v34 = vld [vmem:[#allocation2 + $0xa0] sm:$0xff]  ;;  %v300_v35 = vld [vmem:[#allocation2 + $0xa8] sm:$0xff]  ;;  %v4113_v46 = vld [vmem:[#allocation2 + $0x50] ss:$0 sm:$0xff]  ;;  %s4914_s10 = smov 24   ;;  %vm1804_vm14 = vcmask 130048  }
  0x18   :  { %37 = vperm.xlu0 %4771, %v29_v5   ;;  %4648 = vmatprep.subr.bf16.mxu0 %v4647_v8  ;;  %v4667_v36 = vpack.c.bf16 %v300_v35, %v299_v34  ;;  %v4975_v37 = vld [vmem:[#allocation2 + $0x40] sm:$0xff]  ;;  %v4977_v38 = vld [vmem:[#allocation2 + $0x48] sm:$0xff]  ;;  %v301_v50 = vld [vmem:[#allocation2 + $0xb0] sm:$0xff]  ;;  %vm1807_vm15 = vcmask 195584  }
  0x19   :  { %4660 = vmatprep.subr.bf16.mxu1 %v4659_v31  ;;  %v302_v51 = vld [vmem:[#allocation2 + $0xb8] sm:$0xff] }
  0x1a   :  { %4662 = vmatpush3.bf16.msra.mxu1 %v4659_v31  ;;  %v4671_v54 = vpack.c.bf16 %v302_v51, %v301_v50  ;;  %v4114_v55 = vld [vmem:[#allocation2 + $0x58] ss:$0 sm:$0xff]  ;;  %v4117_v61 = vld [vmem:[#allocation2 + $0x5a] ss:$0 sm:$0xff]  ;;  %v30_v51 = vld [vmem:[%s5503_s1] sm:$0x3] }
  0x1b   :  { %4650 = vmatpush3.bf16.msra.mxu0 %v4647_v8  ;;  %4664 = vmatprep.subr.bf16.mxu1 %v4663_v33  ;;  %vm140_vm6 = vcmp.ne.s32.totalorder %v30_v51, 0 }
  0x1c   :  { %4652 = vmatprep.subr.bf16.mxu0 %v4651_v11  ;;  %413 = vrot.lane.b32.xlu0 %v4975_v37, %s4904_s0 }
  0x1e   :  { %4666 = vmatpush3.bf16.msra.mxu1 %v4663_v33 }
  0x1f   :  { %4654 = vmatpush3.bf16.msra.mxu0 %v4651_v11  ;;  %4668 = vmatprep.subr.bf16.mxu1 %v4667_v36 }
  0x20   :  { %4656 = vmatprep.subr.bf16.mxu0 %v4655_v14  ;;  %405 = vrot.lane.b32.xlu0 %v4975_v37, %s4905_s2 }
  0x23   :  { %4658 = vmatpush3.bf16.msra.mxu0 %v4655_v14 }
  0x24   :  { %4379 = vmatprep.subr.mxu0 %v4903_v15  ;;  %407 = vrot.lane.b32.xlu0 %v4977_v38, %s4905_s2 }
  0x28   :  { %387 = vrot.lane.b32.xlu0 %v4975_v37, %s4906_s30 }
  0x93   :  { %v35_v18 = vpop.permute.xlu0 %34 }
  0x94   :  { %vm39_vm1 = vcmp.eq.s32.totalorder %v4957_v17, %v35_v18 }
  0x95   :  { %v4109_v19 = vsel %vm39_vm1, 1.0, %v4903_v15  ;;  %vm4067_vm1 = vcmask 58368  }
  0x96   :  { %4354 = vmatprep.mubr.msk.f32.mxu0 %vm53_vm0, %v4109_v19 }
  0x97   :  { %v38_v20 = vpop.permute.xlu0 %37 }
  0x98   :  { %vm40_vm2 = vcmp.eq.s32.totalorder %v4957_v17, %v38_v20 }
  0x99   :  { %v4110_v21 = vsel %vm40_vm2, 1.0, %v4903_v15  ;;  %vm4095_vm2 = vcmask 1041409  }
  0x9a   :  { %4355 = vmatmul.mubr.msk.f32.vlgmr.msra.gmra.mrb[0].mxu0 %vm53_vm0, %v4110_v21 }
  0x9b   :  { %v4996_v56 = vpop.permute.xlu0 %413  ;;  %4381 = vmatprep.mubr.msk.f32.mxu0 %vm4908_vm4, %v4903_v15 }
  0x9f   :  { %v5000_v60 = vpop.permute.xlu0 %405 }
  0xa3   :  { %v5004_v4 = vpop.permute.xlu0 %407 }
  0xa7   :  { %v5012_v8 = vpop.permute.xlu0 %387 }
 0x16d   :  { %v4965_v22 = vpop.f32.mrb[0].mxu0 }
 0x16e   :  { %v4967_v23 = vpop.f32.mrb[1].mxu0  ;;  %v186_v26 = vmul.f32 %v4965_v22, %v4965_v22 }
 0x16f   :  { %v185_v24 = vmul.f32 %v4967_v23, %v4967_v23 }
 0x170   :  { %v191_v27 = vsel %vm187_vm3, %v186_v26, 0.0 }
 0x171   :  { %v188_v25 = vsel %vm187_vm3, %v185_v24, 0.0 }
 0x172   :  { %189 = vadd.xlane.f32.xlu1 %v188_v25 }
 0x176   :  { %192 = vadd.xlane.f32.xlu1 %v191_v27 }
 0x187   :  { %415 = vrot.lane.b32.xlu1 %v4977_v38, %s4904_s0 }
 0x1ff   :  { %v190_v39 = vpop.xlane.xlu1 %189 }
 0x200   :  { %v195_v40 = vmul.f32 0.03125, %v190_v39 }
 0x202   :  { %v197_v41 = vadd.f32 1e-06, %v195_v40 }
 0x203   :  { %v193_v42 = vpop.xlane.xlu1 %192 }
 0x204   :  { %4772 = vrsqrt.f32 %v197_v41  ;;  %v196_v43 = vmul.f32 0.03125, %v193_v42 }
 0x206   :  { %v198_v44 = vadd.f32 1e-06, %v196_v43 }
 0x207   :  { %v5002_v63 = vpop.permute.xlu1 %415 }
 0x208   :  { %4774 = vrsqrt.f32 %v198_v44 }
 0x20e   :  { %v4773_v45 = vpop.eup %4772 }
 0x20f   :  { %v201_v47 = vmul.f32 %v4773_v45, %v4967_v23 }
 0x211   :  { %v207_v48 = vmul.f32 %v4113_v46, %v201_v47 }
 0x212   :  { %v4775_v49 = vpop.eup %4774 }
 0x213   :  { %v202_v52 = vmul.f32 %v4775_v49, %v4965_v22  ;;  %4365 = vmatprep.mubr.msk.f32.mxu1 %vm187_vm3, %v207_v48  ;;  %v4911_v49 = vmov 1966171168  }
 0x214   :  { %v143_v50 = vunpack.c.l.s4 %v4911_v49 }
 0x215   :  { %v208_v53 = vmul.f32 %v4113_v46, %v202_v52 }
 0x216   :  { %v144_v52 = vunpack.c.0.s8 %v143_v50 }
 0x217   :  { %4366 = vmatmul.mubr.msk.f32.vlgmr.msra.gmra.mrb[0].mxu1 %vm187_vm3, %v208_v53 }
 0x218   :  { %4670 = vmatpush3.bf16.msra.mxu1 %v4667_v36  ;;  %4376 = vmatprep.mubr.msk.f32.mxu1 %vm187_vm3, %v207_v48 }
 0x219   :  { %4672 = vmatprep.subr.bf16.mxu1 %v4671_v54 }
 0x21c   :  { %4674 = vmatpush3.bf16.msra.mxu1 %v4671_v54 }
 0x21d   :  { %4384 = vmatprep.subr.mxu1 %v4903_v15 }
 0x21f   :  { %4377 = vmatmul.mubr.msk.f32.vlgmr.msra.gmra.mrb[2].mxu1 %vm187_vm3, %v208_v53  ;;  %v5100_v53 = vshrl.u32 %v31_v16, 7 }
 0x220   :  { %4386 = vmatprep.mubr.msk.f32.mxu1 %vm4908_vm4, %v4903_v15 }
 0x221   :  { %v147_v54 = vsub.s32 %v144_v52, %v5100_v53  ;;  %vm139_vm9 = vcmp.le.s32.totalorder %v4957_v17, %v5100_v53 }
 0x2ea   :  { %v4367_v57 = vpop.f32.mrb[0].mxu1 }
 0x2eb   :  { %v4998_v58 = vadd.f32 %v4367_v57, %v4114_v55  ;;  %v290_v59 = vpop.f32.mrb[1].mxu1 }
 0x2ec   :  { %v5010_v7 = vadd.f32 %v4114_v55, %v290_v59  ;;  %v141_v55 = vsel %vm140_vm6, 1, %v4902_v0 }
 0x2ed   :  { %v412_v10 = vmul.f32 %v5004_v4, %v4998_v58  ;;  %v384_v28 = vmul.f32 %v4998_v58, %v4977_v38  ;;  %v148_v57 = vrot.slane %v141_v55, %v147_v54 }
 0x2ee   :  { %v393_v9 = vmul.f32 %v5012_v8, %v5010_v7  ;;  %v411_v14 = vmul.f32 %v5000_v60, %v5010_v7  ;;  %v383_v24 = vmul.f32 %v5010_v7, %v4975_v37 }
 0x2ef   :  { %v149_v59 = vcombine.high %v148_v57, %v148_v57 }
 0x2f2   :  { %v4378_v62 = vpop.f32.mrb[2].mxu1 }
 0x2f3   :  { %v380_v1 = vadd.f32 %v4378_v62, %v4117_v61  ;;  %v374_v2 = vpop.f32.mrb[3].mxu1  ;;  %v172_v62 = vsub.s32 0, %v5100_v53 }
 0x2f4   :  { %v375_v3 = vadd.f32 %v4117_v61, %v374_v2  ;;  %v163_v61 = vrot.slane %v149_v59, %v147_v54 }
 0x2f5   :  { %v420_v5 = vmul.f32 %v5002_v63, %v380_v1  ;;  %v156_v1 = vrot.slane %v148_v57, %v147_v54 }
 0x2f6   :  { %v419_v6 = vmul.f32 %v4996_v56, %v375_v3  ;;  %vm165_vm7 = vcmp.ne.s32.totalorder %v163_v61, 0 }
 0x2f7   :  { %425 = vrot.lane.b32.xlu1 %v420_v5, %s4905_s2  ;;  %v169_v2 = vsel %vm165_vm7, 1, %v4902_v0  ;;  %vm164_vm8 = vcmp.ne.s32.totalorder %v156_v1, 0 }
 0x2f8   :  { %423 = vrot.lane.b32.xlu0 %v419_v6, %s4905_s2  ;;  %v177_v3 = vrot.slane %v169_v2, %v172_v62  ;;  %v168_v16 = vsel %vm164_vm8, 1, %v4902_v0  ;;  %v4912_v6 = vmov -1e+30  }
 0x2f9   :  { %v173_v5 = vrot.slane %v168_v16, %v172_v62 }
 0x2fa   :  { %vm179_vm10 = vcmp.eq.s32.totalorder %v177_v3, 1 }
 0x2fb   :  { %vm181_vm11 = vmand %vm139_vm9, %vm179_vm10  ;;  %vm178_vm12 = vcmp.eq.s32.totalorder %v173_v5, 1 }
 0x2fc   :  { %389 = vrot.lane.b32.xlu0 %v4977_v38, %s4906_s30  ;;  %vm180_vm13 = vmand %vm139_vm9, %vm178_vm12 }
 0x300   :  { %397 = vrot.lane.b32.xlu0 %v393_v9, %s4905_s2  ;;  %v5109_v9 = vsel %vm181_vm11, 0.0, %v4912_v6 }
 0x369   :  { %v426_v11 = vpop.permute.xlu1 %425 }
 0x36a   :  { %v430_v12 = vadd.f32 %v426_v11, %v412_v10  ;;  %v424_v13 = vpop.permute.xlu0 %423 }
 0x36b   :  { %v429_v18 = vadd.f32 %v424_v13, %v411_v14  ;;  %v5116_v14 = vsel %vm180_vm13, 0.0, %v4912_v6 }
 0x36c   :  { %449 = vrot.lane.b32.xlu1 %v430_v12, %s4907_s4 }
 0x36e   :  { %v5024_v19 = vpop.permute.xlu0 %389 }
 0x36f   :  { %v394_v20 = vmul.f32 %v5024_v19, %v4998_v58 }
 0x370   :  { %447 = vrot.lane.b32.xlu1 %v429_v18, %s4907_s4 }
 0x371   :  { %399 = vrot.lane.b32.xlu0 %v394_v20, %s4905_s2 }
 0x372   :  { %v398_v21 = vpop.permute.xlu0 %397 }
 0x373   :  { %v403_v25 = vadd.f32 %v398_v21, %v383_v24 }
 0x374   :  { %451 = vrot.lane.b32.xlu1 %v429_v18, %s4909_s5 }
 0x375   :  { %453 = vrot.lane.b32.xlu0 %v430_v12, %s4909_s5 }
 0x378   :  { %455 = vrot.lane.b32.xlu1 %v429_v18, %s4910_s6 }
 0x379   :  { %457 = vrot.lane.b32.xlu0 %v430_v12, %s4910_s6 }
 0x37c   :  { %433 = vrot.lane.b32.xlu1 %v403_v25, %s4907_s4 }
 0x37d   :  { %550 = vrot.lane.b32.xlu0 %v430_v12, %s4904_s0 }
 0x380   :  { %437 = vrot.lane.b32.xlu1 %v403_v25, %s4909_s5 }
 0x384   :  { %473 = vrot.lane.b32.xlu1 %v429_v18, %s4904_s0 }
 0x3de   :  { %v450_v26 = vpop.permute.xlu1 %449 }
 0x3e2   :  { %v448_v27 = vpop.permute.xlu1 %447 }
 0x3e3   :  { %626 = vrot.lane.b32.xlu1 %v448_v27, %s4904_s0  ;;  %v400_v29 = vpop.permute.xlu0 %399 }
 0x3e4   :  { %v404_v30 = vadd.f32 %v400_v29, %v384_v28 }
 0x3e6   :  { %v452_v31 = vpop.permute.xlu1 %451  ;;  %435 = vrot.lane.b32.xlu0 %v404_v30, %s4907_s4 }
 0x3e7   :  { %778 = vrot.lane.b32.xlu1 %v452_v31, %s4904_s0  ;;  %v454_v32 = vpop.permute.xlu0 %453 }
 0x3ea   :  { %v456_v33 = vpop.permute.xlu1 %455  ;;  %439 = vrot.lane.b32.xlu0 %v404_v30, %s4909_s5 }
 0x3eb   :  { %930 = vrot.lane.b32.xlu1 %v456_v33, %s4904_s0  ;;  %v458_v34 = vpop.permute.xlu0 %457 }
 0x3ee   :  { %v434_v35 = vpop.permute.xlu1 %433  ;;  %702 = vrot.lane.b32.xlu0 %v450_v26, %s4904_s0 }
 0x3ef   :  { %441 = vrot.lane.b32.xlu1 %v403_v25, %s4910_s6  ;;  %v551_v36 = vpop.permute.xlu0 %550 }
 0x3f0   :  { %4385 = vmatpush3.xpose.msk.msra.mxu1 %vm475_vm5, %v551_v36 }
 0x3f1   :  { %4394 = vmatprep.subr.mxu1 %v4903_v15 }
 0x3f2   :  { %v438_v37 = vpop.permute.xlu1 %437  ;;  %854 = vrot.lane.b32.xlu0 %v454_v32, %s4904_s0 }
 0x3f3   :  { %4387 = vmatmul.mubr.msk.f32.vlgmr.msra.gmra.mrb[4].mxu1 %vm475_vm5, %v404_v30 }
 0x3f4   :  { %4396 = vmatprep.mubr.msk.f32.mxu1 %vm4908_vm4, %v4903_v15 }
 0x3f6   :  { %v474_v38 = vpop.permute.xlu1 %473  ;;  %1006 = vrot.lane.b32.xlu0 %v458_v34, %s4904_s0 }
 0x3f7   :  { %4380 = vmatpush3.xpose.msk.msra.mxu0 %vm475_vm5, %v474_v38 }
 0x3f8   :  { %4389 = vmatprep.subr.mxu0 %v4903_v15 }
 0x3fa   :  { %4382 = vmatmul.mubr.msk.f32.vlgmr.msra.gmra.mrb[2].mxu0 %vm475_vm5, %v403_v25  ;;  %443 = vrot.lane.b32.xlu0 %v404_v30, %s4910_s6 }
 0x3fb   :  { %4391 = vmatprep.mubr.msk.f32.mxu0 %vm4908_vm4, %v4903_v15 }
 0x455   :  { %v627_v39 = vpop.permute.xlu1 %626 }
 0x456   :  { %4390 = vmatpush3.xpose.msk.msra.mxu0 %vm475_vm5, %v627_v39 }
 0x457   :  { %4399 = vmatprep.subr.mxu0 %v4903_v15 }
 0x458   :  { %v436_v40 = vpop.permute.xlu0 %435 }
 0x459   :  { %4392 = vmatmul.mubr.msk.f32.vlgmr.msra.gmra.mrb[4].mxu0 %vm475_vm5, %v434_v35  ;;  %v779_v41 = vpop.permute.xlu1 %778 }
 0x45a   :  { %4400 = vmatpush3.xpose.msk.msra.mxu0 %vm475_vm5, %v779_v41  ;;  %4401 = vmatprep.mubr.msk.f32.mxu0 %vm4908_vm4, %v4903_v15 }
 0x45b   :  { %4409 = vmatprep.subr.mxu0 %v4903_v15 }
 0x45c   :  { %v440_v42 = vpop.permute.xlu0 %439 }
 0x45d   :  { %4402 = vmatmul.mubr.msk.f32.vlgmr.msra.gmra.mrb[6].mxu0 %vm475_vm5, %v438_v37  ;;  %v931_v43 = vpop.permute.xlu1 %930 }
 0x45e   :  { %4410 = vmatpush3.xpose.msk.msra.mxu0 %vm475_vm5, %v931_v43  ;;  %4411 = vmatprep.mubr.msk.f32.mxu0 %vm4908_vm4, %v4903_v15 }
 0x45f   :  { %4419 = vmatprep.subr.mxu0 %v4903_v15 }
 0x460   :  { %v703_v44 = vpop.permute.xlu0 %702 }
 0x461   :  { %v442_v45 = vpop.permute.xlu1 %441  ;;  %4395 = vmatpush3.xpose.msk.msra.mxu1 %vm475_vm5, %v703_v44 }
 0x462   :  { %4412 = vmatmul.mubr.msk.f32.vlgmr.msra.gmra.mrb[8].mxu0 %vm475_vm5, %v442_v45  ;;  %4404 = vmatprep.subr.mxu1 %v4903_v15 }
 0x463   :  { %4421 = vmatprep.mubr.msk.f32.mxu0 %vm4908_vm4, %v4903_v15 }
 0x464   :  { %4397 = vmatmul.mubr.msk.f32.vlgmr.msra.gmra.mrb[6].mxu1 %vm475_vm5, %v436_v40  ;;  %v855_v46 = vpop.permute.xlu0 %854 }
 0x465   :  { %4405 = vmatpush3.xpose.msk.msra.mxu1 %vm475_vm5, %v855_v46  ;;  %4406 = vmatprep.mubr.msk.f32.mxu1 %vm4908_vm4, %v4903_v15 }
 0x466   :  { %4414 = vmatprep.subr.mxu1 %v4903_v15 }
 0x468   :  { %4407 = vmatmul.mubr.msk.f32.vlgmr.msra.gmra.mrb[8].mxu1 %vm475_vm5, %v440_v42  ;;  %v1007_v47 = vpop.permute.xlu0 %1006 }
 0x469   :  { %4415 = vmatpush3.xpose.msk.msra.mxu1 %vm475_vm5, %v1007_v47  ;;  %4416 = vmatprep.mubr.msk.f32.mxu1 %vm4908_vm4, %v4903_v15 }
 0x46a   :  { %4424 = vmatprep.subr.mxu1 %v4903_v15 }
 0x46c   :  { %v444_v48 = vpop.permute.xlu0 %443 }
 0x46d   :  { %4417 = vmatmul.mubr.msk.f32.vlgmr.msra.gmra.mrb[10].mxu1 %vm475_vm5, %v444_v48 }
 0x46e   :  { %4426 = vmatprep.mubr.msk.f32.mxu1 %vm4908_vm4, %v4903_v15 }
 0x4c6   :  { %v622_v10 = vpop.f32.mrb[4].mxu1 }
 0x4c7   :  { %v5112_v11 = vadd.f32 %v622_v10, %v5109_v9  ;;  %v4388_v12 = vpop.f32.mrb[5].mxu1 }
 0x4c9   :  { %v1085_v13 = vsel %vm475_vm5, %v5112_v11, -inf }
 0x4ca   :  { %1086 = vmax.xlane.f32.xlu0 %v1085_v13 }
 0x4cd   :  { %v546_v0 = vpop.f32.mrb[2].mxu0 }
 0x4ce   :  { %v5119_v18 = vadd.f32 %v546_v0, %v5116_v14  ;;  %v4383_v20 = vpop.f32.mrb[3].mxu0 }
 0x4d0   :  { %v1082_v21 = vsel %vm475_vm5, %v5119_v18, -inf }
 0x4d1   :  { %1083 = vmax.xlane.f32.xlu1 %v1082_v21 }
 0x52c   :  { %v698_v24 = vpop.f32.mrb[4].mxu0 }
 0x52d   :  { %v5124_v25 = vadd.f32 %v698_v24, %v5116_v14  ;;  %v4393_v26 = vpop.f32.mrb[5].mxu0 }
 0x52f   :  { %v1088_v27 = vsel %vm475_vm5, %v5124_v25, -inf }
 0x530   :  { %v850_v28 = vpop.f32.mrb[6].mxu0  ;;  %1089 = vmax.xlane.f32.xlu0 %v1088_v27 }
 0x531   :  { %v5129_v29 = vadd.f32 %v850_v28, %v5116_v14  ;;  %v4403_v30 = vpop.f32.mrb[7].mxu0 }
 0x533   :  { %v1094_v31 = vsel %vm475_vm5, %v5129_v29, -inf }
 0x534   :  { %1095 = vmax.xlane.f32.xlu0 %v1094_v31 }
 0x535   :  { %v1002_v32 = vpop.f32.mrb[8].mxu0 }
 0x536   :  { %v5134_v33 = vadd.f32 %v1002_v32, %v5116_v14  ;;  %v4413_v34 = vpop.f32.mrb[9].mxu0 }
 0x537   :  { %v774_v35 = vpop.f32.mrb[6].mxu1 }
 0x538   :  { %v775_v36 = vadd.f32 %v774_v35, %v5109_v9  ;;  %v4398_v37 = vpop.f32.mrb[7].mxu1  ;;  %v1100_v38 = vsel %vm475_vm5, %v5134_v33, -inf }
 0x539   :  { %1101 = vmax.xlane.f32.xlu0 %v1100_v38 }
 0x53a   :  { %v1091_v39 = vsel %vm475_vm5, %v775_v36, -inf }
 0x53b   :  { %1092 = vmax.xlane.f32.xlu1 %v1091_v39  ;;  %v926_v40 = vpop.f32.mrb[8].mxu1 }
 0x53c   :  { %v927_v41 = vadd.f32 %v926_v40, %v5109_v9  ;;  %v4408_v42 = vpop.f32.mrb[9].mxu1 }
 0x53e   :  { %v1097_v43 = vsel %vm475_vm5, %v927_v41, -inf }
 0x53f   :  { %1098 = vmax.xlane.f32.xlu1 %v1097_v43 }
 0x540   :  { %v1078_v44 = vpop.f32.mrb[10].mxu1 }
 0x541   :  { %v1079_v45 = vadd.f32 %v1078_v44, %v5109_v9  ;;  %v4418_v46 = vpop.f32.mrb[11].mxu1 }
 0x543   :  { %v1103_v47 = vsel %vm475_vm5, %v1079_v45, -inf }
 0x544   :  { %1104 = vmax.xlane.f32.xlu1 %v1103_v47 }
 0x54f   :  { %461 = vrot.lane.b32.xlu0 %v5010_v7, %s4907_s4 }
 0x553   :  { %467 = vrot.lane.b32.xlu0 %v4998_v58, %s4909_s5 }
 0x555   :  { %463 = vrot.lane.b32.xlu1 %v4998_v58, %s4907_s4 }
 0x557   :  { %471 = vrot.lane.b32.xlu0 %v4998_v58, %s4910_s6  ;;  %v1087_v48 = vpop.xlane.xlu0 %1086 }
 0x558   :  { %v1107_v16 = vsub.f32 %v5112_v11, %v1087_v48 }
 0x559   :  { %465 = vrot.lane.b32.xlu1 %v5010_v7, %s4909_s5 }
 0x55a   :  { %v1116_v5 = vmul.f32 1.442695, %v1107_v16 }
 0x55b   :  { %1170 = vrot.lane.b32.xlu0 %v5010_v7, %s4906_s30 }
 0x55c   :  { %4776 = vpow2.f32 %v1116_v5 }
 0x55d   :  { %469 = vrot.lane.b32.xlu1 %v5010_v7, %s4910_s6 }
 0x55e   :  { %v1084_v51 = vpop.xlane.xlu1 %1083 }
 0x55f   :  { %v1106_v10 = vsub.f32 %v5119_v18, %v1084_v51 }
 0x561   :  { %1246 = vrot.lane.b32.xlu1 %v4998_v58, %s4906_s30  ;;  %v1114_v0 = vmul.f32 1.442695, %v1106_v10 }
 0x566   :  { %v4777_v30 = vpop.eup %4776 }
 0x5bd   :  { %v1090_v49 = vpop.xlane.xlu0 %1089 }
 0x5be   :  { %v1108_v6 = vsub.f32 %v5124_v25, %v1090_v49 }
 0x5c0   :  { %v1118_v12 = vmul.f32 1.442695, %v1108_v6 }
 0x5c1   :  { %v1096_v50 = vpop.xlane.xlu0 %1095 }
 0x5c2   :  { %v1110_v13 = vsub.f32 %v5129_v29, %v1096_v50  ;;  %4778 = vpow2.f32 %v1118_v12  ;;  %v1133_v29 = vsel %vm475_vm5, %v4777_v30, 0.0 }
 0x5c3   :  { %4780 = vpow2.f32 %v1114_v0 }
 0x5c4   :  { %v1122_v21 = vmul.f32 1.442695, %v1110_v13 }
 0x5c6   :  { %v1102_v52 = vpop.xlane.xlu0 %1101  ;;  %4782 = vpow2.f32 %v1122_v21 }
 0x5c7   :  { %v1112_v24 = vsub.f32 %v5134_v33, %v1102_v52 }
 0x5c8   :  { %v1093_v54 = vpop.xlane.xlu1 %1092 }
 0x5c9   :  { %v1109_v20 = vsub.f32 %v775_v36, %v1093_v54  ;;  %v1126_v27 = vmul.f32 1.442695, %v1112_v24 }
 0x5ca   :  { %v462_v55 = vpop.permute.xlu0 %461 }
 0x5cb   :  { %1322 = vrot.lane.b32.xlu1 %v462_v55, %s4906_s30  ;;  %v1120_v26 = vmul.f32 1.442695, %v1109_v20 }
 0x5cc   :  { %v1099_v57 = vpop.xlane.xlu1 %1098  ;;  %v4779_v31 = vpop.eup %4778 }
 0x5cd   :  { %v1111_v11 = vsub.f32 %v927_v41, %v1099_v57  ;;  %4784 = vpow2.f32 %v1120_v26  ;;  %v4781_v32 = vpop.eup %4780  ;;  %v1136_v33 = vsel %vm475_vm5, %v4779_v31, 0.0 }
 0x5ce   :  { %v468_v59 = vpop.permute.xlu0 %467  ;;  %4786 = vpow2.f32 %v1126_v27  ;;  %v1130_v35 = vsel %vm475_vm5, %v4781_v32, 0.0  ;;  %v1811_v27 = vld [vmem:[#allocation2 + $0xe8] sm:$0xff] }
 0x5cf   :  { %v1124_v28 = vmul.f32 1.442695, %v1111_v11  ;;  %v1810_v11 = vld [vmem:[#allocation2 + $0xe0] sm:$0xff] }
 0x5d0   :  { %v4783_v34 = vpop.eup %4782 }
 0x5d1   :  { %v1105_v61 = vpop.xlane.xlu1 %1104  ;;  %4788 = vpow2.f32 %v1124_v28  ;;  %v1142_v37 = vsel %vm475_vm5, %v4783_v34, 0.0  ;;  %v4675_v28 = vpack.c.bf16 %v1811_v27, %v1810_v11 }
 0x5d2   :  { %v472_v62 = vpop.permute.xlu0 %471  ;;  %v1113_v25 = vsub.f32 %v1079_v45, %v1105_v61 }
 0x5d4   :  { %v1128_v18 = vmul.f32 1.442695, %v1113_v25 }
 0x5d5   :  { %v464_v1 = vpop.permute.xlu1 %463 }
 0x5d6   :  { %1398 = vrot.lane.b32.xlu0 %v464_v1, %s4906_s30  ;;  %v1171_v7 = vpop.permute.xlu0 %1170  ;;  %4790 = vpow2.f32 %v1128_v18  ;;  %v1812_v18 = vld [vmem:[#allocation2 + $0xf0] sm:$0xff] }
 0x5d7   :  { %4420 = vmatpush3.msra.mxu0 %v1171_v7  ;;  %v4785_v36 = vpop.eup %4784 }
 0x5d8   :  { %4429 = vmatprep.subr.mxu0 %v4903_v15  ;;  %v5175_v38 = vpop.eup %4786  ;;  %v1139_v39 = vsel %vm475_vm5, %v4785_v36, 0.0 }
 0x5d9   :  { %v466_v58 = vpop.permute.xlu1 %465  ;;  %v1148_v41 = vsel %vm475_vm5, %v5175_v38, 0.0 }
 0x5da   :  { %1474 = vrot.lane.b32.xlu1 %v466_v58, %s4906_s30  ;;  %1550 = vrot.lane.b32.xlu0 %v468_v59, %s4906_s30 }
 0x5db   :  { %v4789_v40 = vpop.eup %4788 }
 0x5dc   :  { %v1145_v42 = vsel %vm475_vm5, %v4789_v40, 0.0 }
 0x5dd   :  { %v470_v2 = vpop.permute.xlu1 %469 }
 0x5e0   :  { %v5181_v43 = vpop.eup %4790 }
 0x5e1   :  { %v1247_v3 = vpop.permute.xlu1 %1246  ;;  %v1151_v44 = vsel %vm475_vm5, %v5181_v43, 0.0 }
 0x5e2   :  { %4425 = vmatpush3.msra.mxu1 %v1247_v3 }
 0x5e3   :  { %4434 = vmatprep.subr.mxu1 %v4903_v15 }
 0x5f9   :  { %1134 = vadd.xlane.f32.xlu0 %v1133_v29  ;;  %v1813_v29 = vld [vmem:[#allocation2 + $0xf8] sm:$0xff] }
 0x5fd   :  { %1137 = vadd.xlane.f32.xlu0 %v1136_v33 }
 0x5fe   :  { %1131 = vadd.xlane.f32.xlu1 %v1130_v35 }
 0x601   :  { %1143 = vadd.xlane.f32.xlu0 %v1142_v37 }
 0x602   :  { %1140 = vadd.xlane.f32.xlu1 %v1139_v39 }
 0x605   :  { %1149 = vadd.xlane.f32.xlu0 %v1148_v41 }
 0x606   :  { %1146 = vadd.xlane.f32.xlu1 %v1145_v42 }
 0x60a   :  { %1152 = vadd.xlane.f32.xlu1 %v1151_v44 }
 0x61b   :  { %1626 = vrot.lane.b32.xlu1 %v470_v2, %s4906_s30  ;;  %1702 = vrot.lane.b32.xlu0 %v472_v62, %s4906_s30 }
 0x63d   :  { %v1323_v47 = vpop.permute.xlu1 %1322 }
 0x648   :  { %v1399_v45 = vpop.permute.xlu0 %1398 }
 0x64c   :  { %v1551_v46 = vpop.permute.xlu0 %1550  ;;  %v1475_v49 = vpop.permute.xlu1 %1474 }
 0x686   :  { %v1135_v48 = vpop.xlane.xlu0 %1134 }
 0x687   :  { %4792 = vrcp.f32 %v1135_v48 }
 0x68a   :  { %v1138_v50 = vpop.xlane.xlu0 %1137 }
 0x68b   :  { %v1132_v51 = vpop.xlane.xlu1 %1131 }
 0x68c   :  { %4794 = vrcp.f32 %v1132_v51 }
 0x68d   :  { %4796 = vrcp.f32 %v1138_v50 }
 0x68e   :  { %v1144_v52 = vpop.xlane.xlu0 %1143 }
 0x68f   :  { %v1141_v54 = vpop.xlane.xlu1 %1140 }
 0x690   :  { %4798 = vrcp.f32 %v1141_v54 }
 0x691   :  { %v4793_v55 = vpop.eup %4792  ;;  %4800 = vrcp.f32 %v1144_v52 }
 0x692   :  { %v1157_v57 = vmul.f32 %v4793_v55, %v4777_v30  ;;  %v1150_v59 = vpop.xlane.xlu0 %1149 }
 0x693   :  { %v1147_v61 = vpop.xlane.xlu1 %1146 }
 0x694   :  { %4802 = vrcp.f32 %v1147_v61  ;;  %4427 = vmatmul.mubr.msk.f32.vlgmr.msra.gmra.mrb[12].mxu1 %vm475_vm5, %v1157_v57 }
 0x695   :  { %4435 = vmatpush3.msra.mxu1 %v1399_v45  ;;  %4436 = vmatprep.mubr.msk.f32.mxu1 %vm4908_vm4, %v4903_v15  ;;  %4804 = vrcp.f32 %v1150_v59 }
 0x696   :  { %v4795_v62 = vpop.eup %4794  ;;  %4444 = vmatprep.subr.mxu1 %v4903_v15  ;;  %v1703_v0 = vpop.permute.xlu0 %1702 }
 0x697   :  { %v1155_v1 = vmul.f32 %v4795_v62, %v4781_v32  ;;  %v1153_v7 = vpop.xlane.xlu1 %1152  ;;  %v4797_v58 = vpop.eup %4796 }
 0x698   :  { %4806 = vrcp.f32 %v1153_v7  ;;  %v1159_v3 = vmul.f32 %v4797_v58, %v4779_v31  ;;  %v4679_v31 = vpack.c.bf16 %v1813_v29, %v1812_v18 }
 0x699   :  { %4422 = vmatmul.mubr.msk.f32.vlgmr.msra.gmra.mrb[10].mxu0 %vm475_vm5, %v1155_v1 }
 0x69a   :  { %v4799_v2 = vpop.eup %4798  ;;  %4430 = vmatpush3.msra.mxu0 %v1323_v47  ;;  %4431 = vmatprep.mubr.msk.f32.mxu0 %vm4908_vm4, %v4903_v15 }
 0x69b   :  { %v1161_v16 = vmul.f32 %v4799_v2, %v4785_v36  ;;  %4439 = vmatprep.subr.mxu0 %v4903_v15  ;;  %v4801_v5 = vpop.eup %4800  ;;  %v1627_v20 = vpop.permute.xlu1 %1626 }
 0x69c   :  { %v1163_v10 = vmul.f32 %v4801_v5, %v4783_v34 }
 0x69d   :  { %4432 = vmatmul.mubr.msk.f32.vlgmr.msra.gmra.mrb[12].mxu0 %vm475_vm5, %v1159_v3  ;;  %4437 = vmatmul.mubr.msk.f32.vlgmr.msra.gmra.mrb[14].mxu1 %vm475_vm5, %v1161_v16 }
 0x69e   :  { %v4803_v6 = vpop.eup %4802  ;;  %4440 = vmatpush3.msra.mxu0 %v1475_v49  ;;  %4445 = vmatpush3.msra.mxu1 %v1551_v46 }
 0x69f   :  { %v1165_v12 = vmul.f32 %v4803_v6, %v4789_v40  ;;  %4441 = vmatprep.mubr.msk.f32.mxu0 %vm4908_vm4, %v4903_v15  ;;  %4446 = vmatprep.mubr.msk.f32.mxu1 %vm4908_vm4, %v4903_v15  ;;  %v4805_v13 = vpop.eup %4804  ;;  %v1920_v6 = vld [vmem:[#allocation2 + $0x120] sm:$0xff] }
 0x6a0   :  { %4449 = vmatprep.subr.mxu0 %v4903_v15  ;;  %4454 = vmatprep.subr.mxu1 %v4903_v15  ;;  %v1167_v24 = vmul.f32 %v4805_v13, %v5175_v38  ;;  %v1923_v13 = vld [vmem:[#allocation2 + $0x138] sm:$0xff] }
 0x6a1   :  { %4442 = vmatmul.mubr.msk.f32.vlgmr.msra.gmra.mrb[14].mxu0 %vm475_vm5, %v1163_v10  ;;  %4447 = vmatmul.mubr.msk.f32.vlgmr.msra.gmra.mrb[16].mxu1 %vm475_vm5, %v1165_v12  ;;  %v1921_v10 = vld [vmem:[#allocation2 + $0x128] sm:$0xff] }
 0x6a2   :  { %v4807_v21 = vpop.eup %4806  ;;  %4450 = vmatpush3.msra.mxu0 %v1627_v20  ;;  %4455 = vmatpush3.msra.mxu1 %v1703_v0  ;;  %v4683_v12 = vpack.c.bf16 %v1921_v10, %v1920_v6 }
 0x6a3   :  { %v1169_v26 = vmul.f32 %v4807_v21, %v5181_v43  ;;  %4451 = vmatprep.mubr.msk.f32.mxu0 %vm4908_vm4, %v4903_v15  ;;  %4456 = vmatprep.mubr.msk.f32.mxu1 %vm4908_vm4, %v4903_v15 }
 0x6a4   :  { %4676 = vmatprep.subr.bf16.mxu1 %v4675_v28 }
 0x6a5   :  { %4452 = vmatmul.mubr.msk.f32.vlgmr.msra.gmra.mrb[16].mxu0 %vm475_vm5, %v1167_v24  ;;  %4457 = vmatmul.mubr.msk.f32.vlgmr.msra.gmra.mrb[18].mxu1 %vm475_vm5, %v1169_v26 }
 0x6a6   :  { %4678 = vmatpush3.bf16.msra.mxu1 %v4675_v28 }
 0x6a7   :  { %4680 = vmatprep.subr.bf16.mxu1 %v4679_v31 }
 0x6aa   :  { %4682 = vmatpush3.bf16.msra.mxu1 %v4679_v31 }
 0x6ab   :  { %4684 = vmatprep.subr.bf16.mxu1 %v4683_v12 }
 0x767   :  { %v1318_v25 = vpop.f32.mrb[12].mxu1 }
 0x768   :  { %v4428_v30 = vpop.f32.mrb[13].mxu1 }
 0x76c   :  { %v1242_v32 = vpop.f32.mrb[10].mxu0 }
 0x76d   :  { %v4423_v33 = vpop.f32.mrb[11].mxu0 }
 0x76e   :  { %v2030_v33 = vld [vmem:[#allocation2 + $0x168] sm:$0xff] }
 0x770   :  { %v1394_v34 = vpop.f32.mrb[12].mxu0  ;;  %v1470_v35 = vpop.f32.mrb[14].mxu1 }
 0x771   :  { %1782 = vrot.lane.b32.xlu0 %v1470_v35, %s4901_s23  ;;  %v4438_v36 = vpop.f32.mrb[15].mxu1  ;;  %1780 = vrot.lane.b32.xlu1 %v1394_v34, %s4901_s23  ;;  %v4433_v37 = vpop.f32.mrb[13].mxu0  ;;  %v2031_v34 = vld [vmem:[#allocation2 + $0x170] sm:$0xff] }
 0x772   :  { %v2032_v36 = vld [vmem:[#allocation2 + $0x178] sm:$0xff] }
 0x773   :  { %v4695_v37 = vpack.c.bf16 %v2032_v36, %v2031_v34  ;;  %v2236_v36 = vld [vmem:[#allocation2 + $0xd8] sm:$0xff] }
 0x774   :  { %v1546_v38 = vpop.f32.mrb[14].mxu0  ;;  %v1622_v39 = vpop.f32.mrb[16].mxu1 }
 0x775   :  { %1790 = vrot.lane.b32.xlu0 %v1622_v39, %s4913_s9  ;;  %v4448_v40 = vpop.f32.mrb[17].mxu1  ;;  %1788 = vrot.lane.b32.xlu1 %v1546_v38, %s4913_s9  ;;  %v4443_v41 = vpop.f32.mrb[15].mxu0  ;;  %v2033_v38 = vld [vmem:[#allocation2 + $0x180] sm:$0xff]  ;;  %v2034_v39 = vld [vmem:[#allocation2 + $0x188] sm:$0xff] }
 0x776   :  { %v4699_v40 = vpack.c.bf16 %v2034_v39, %v2033_v38  ;;  %v2035_v41 = vld [vmem:[#allocation2 + $0x190] sm:$0xff] }
 0x778   :  { %v1698_v42 = vpop.f32.mrb[16].mxu0  ;;  %v1774_v43 = vpop.f32.mrb[18].mxu1 }
 0x779   :  { %1796 = vrot.lane.b32.xlu1 %v1698_v42, %s4914_s10  ;;  %v4453_v44 = vpop.f32.mrb[17].mxu0  ;;  %1798 = vrot.lane.b32.xlu0 %v1774_v43, %s4914_s10  ;;  %v4458_v45 = vpop.f32.mrb[19].mxu1  ;;  %v2036_v42 = vld [vmem:[#allocation2 + $0x198] sm:$0xff] }
 0x77a   :  { %v4703_v43 = vpack.c.bf16 %v2036_v42, %v2035_v41  ;;  %v4157_v42 = vld [vmem:[#allocation2 + $0x5b] ss:$0 sm:$0xff] }
 0x7e3   :  { %v1781_v46 = vpop.permute.xlu1 %1780  ;;  %v1783_v47 = vpop.permute.xlu0 %1782 }
 0x7e4   :  { %v1802_v50 = vsel %vm475_vm5, %v1242_v32, %v1781_v46  ;;  %v1803_v51 = vsel %vm475_vm5, %v1318_v25, %v1783_v47  ;;  %v4146_v25 = vld [vmem:[#allocation2 + $0x52] ss:$0 sm:$0xff]  ;;  %v2029_v32 = vld [vmem:[#allocation2 + $0x160] sm:$0xff] }
 0x7e5   :  { %v4691_v35 = vpack.c.bf16 %v2030_v33, %v2029_v32  ;;  %v4153_v32 = vld [vmem:[#allocation2 + $0x51] ss:$0 sm:$0xff] }
 0x7e7   :  { %v1789_v48 = vpop.permute.xlu1 %1788  ;;  %v1791_v49 = vpop.permute.xlu0 %1790  ;;  %4692 = vmatprep.subr.bf16.mxu0 %v4691_v35 }
 0x7e8   :  { %v1805_v52 = vsel %vm1804_vm14, %v1802_v50, %v1789_v48  ;;  %v1806_v54 = vsel %vm1804_vm14, %v1803_v51, %v1791_v49  ;;  %4694 = vmatpush3.bf16.msra.mxu0 %v4691_v35  ;;  %v2235_v35 = vld [vmem:[#allocation2 + $0xd0] sm:$0xff] }
 0x7e9   :  { %4696 = vmatprep.subr.bf16.mxu0 %v4695_v37  ;;  %v4719_v39 = vpack.c.bf16 %v2236_v36, %v2235_v35 }
 0x7eb   :  { %v1797_v55 = vpop.permute.xlu1 %1796  ;;  %v1799_v57 = vpop.permute.xlu0 %1798 }
 0x7ec   :  { %v1808_v59 = vsel %vm1807_vm15, %v1805_v52, %v1797_v55  ;;  %v1809_v61 = vsel %vm1807_vm15, %v1806_v54, %v1799_v57  ;;  %4698 = vmatpush3.bf16.msra.mxu0 %v4695_v37 }
 0x7ed   :  { %4467 = vmatprep.mubr.msk.f32.mxu1 %vm187_vm3, %v1808_v59  ;;  %4700 = vmatprep.subr.bf16.mxu0 %v4699_v40 }
 0x7ee   :  { %4468 = vmatmul.mubr.msk.f32.vlgmr.msra.gmra.mrb[20].mxu1 %vm187_vm3, %v1809_v61 }
 0x7ef   :  { %4686 = vmatpush3.bf16.msra.mxu1 %v4683_v12 }
 0x7f0   :  { %4702 = vmatpush3.bf16.msra.mxu0 %v4699_v40 }
 0x7f1   :  { %4704 = vmatprep.subr.bf16.mxu0 %v4703_v43 }
 0x7f4   :  { %4706 = vmatpush3.bf16.msra.mxu0 %v4703_v43 }
 0x7f5   :  { %4522 = vmatprep.subr.mxu0 %v4903_v15 }
 0x8c1   :  { %v4469_v62 = vpop.f32.mrb[20].mxu1 }
 0x8c2   :  { %v5228_v1 = vadd.f32 %v4469_v62, %v4965_v22  ;;  %v1886_v7 = vpop.f32.mrb[21].mxu1  ;;  %v1922_v22 = vld [vmem:[#allocation2 + $0x130] sm:$0xff] }
 0x8c3   :  { %v5231_v58 = vadd.f32 %v1886_v7, %v4967_v23  ;;  %v4687_v0 = vpack.c.bf16 %v1923_v13, %v1922_v22  ;;  %v2143_v13 = vld [vmem:[#allocation2 + $0x80] sm:$0xff] }
 0x8c4   :  { %v1899_v2 = vmul.f32 %v5228_v1, %v5228_v1 }
 0x8c5   :  { %v1898_v3 = vmul.f32 %v5231_v58, %v5231_v58  ;;  %4688 = vmatprep.subr.bf16.mxu1 %v4687_v0 }
 0x8c6   :  { %v1903_v16 = vsel %vm187_vm3, %v1899_v2, 0.0  ;;  %4690 = vmatpush3.bf16.msra.mxu1 %v4687_v0  ;;  %v2144_v0 = vld [vmem:[#allocation2 + $0x88] sm:$0xff] }
 0x8c7   :  { %1904 = vadd.xlane.f32.xlu0 %v1903_v16  ;;  %v1900_v5 = vsel %vm187_vm3, %v1898_v3, 0.0 }
 0x8c8   :  { %1901 = vadd.xlane.f32.xlu1 %v1900_v5 }
 0x954   :  { %v1905_v23 = vpop.xlane.xlu0 %1904 }
 0x955   :  { %v1907_v20 = vmul.f32 0.03125, %v1905_v23  ;;  %v1902_v21 = vpop.xlane.xlu1 %1901  ;;  %v4707_v23 = vpack.c.bf16 %v2144_v0, %v2143_v13 }
 0x956   :  { %v1906_v24 = vmul.f32 0.03125, %v1902_v21 }
 0x957   :  { %v1909_v26 = vadd.f32 1e-06, %v1907_v20  ;;  %v2146_v20 = vld [vmem:[#allocation2 + $0x98] sm:$0xff]  ;;  %4708 = vmatprep.subr.bf16.mxu1 %v4707_v23 }
 0x958   :  { %v1908_v11 = vadd.f32 1e-06, %v1906_v24  ;;  %v2234_v24 = vld [vmem:[#allocation2 + $0xc8] sm:$0xff] }
 0x959   :  { %4808 = vrsqrt.f32 %v1909_v26 }
 0x95a   :  { %4810 = vrsqrt.f32 %v1908_v11 }
 0x963   :  { %v4809_v27 = vpop.eup %4808 }
 0x964   :  { %v4811_v28 = vpop.eup %4810  ;;  %v1913_v30 = vmul.f32 %v4809_v27, %v5228_v1 }
 0x965   :  { %v1912_v18 = vmul.f32 %v4811_v28, %v5231_v58 }
 0x966   :  { %v1919_v31 = vmul.f32 %v4146_v25, %v1913_v30 }
 0x967   :  { %v1918_v29 = vmul.f32 %v4146_v25, %v1912_v18 }
 0x969   :  { %4478 = vmatprep.mubr.msk.f32.mxu1 %vm187_vm3, %v1918_v29 }
 0x96a   :  { %4479 = vmatmul.mubr.msk.f32.vlgmr.msra.gmra.mrb[22].mxu1 %vm187_vm3, %v1919_v31 }
 0x96b   :  { %4710 = vmatpush3.bf16.msra.mxu1 %v4707_v23 }
 0xa3d   :  { %v4480_v44 = vpop.f32.mrb[22].mxu1 }
 0xa3e   :  { %2023 = vrot.lane.b32.xlu1 %v4480_v44, %s4906_s30  ;;  %v1996_v45 = vpop.f32.mrb[23].mxu1  ;;  %v4150_v47 = vmul.f32 -1.442695, %v4480_v44 }
 0xa3f   :  { %2021 = vrot.lane.b32.xlu0 %v1996_v45, %s4906_s30  ;;  %v4149_v46 = vmul.f32 -1.442695, %v1996_v45 }
 0xa41   :  { %4812 = vpow2.f32 %v4149_v46 }
 0xa42   :  { %4814 = vpow2.f32 %v4150_v47 }
 0xa4b   :  { %v4813_v48 = vpop.eup %4812 }
 0xa4c   :  { %v4815_v49 = vpop.eup %4814  ;;  %v2011_v50 = vadd.f32 1.0, %v4813_v48 }
 0xa4d   :  { %v2012_v51 = vadd.f32 1.0, %v4815_v49 }
 0xa4e   :  { %4816 = vrcp.f32 %v2011_v50 }
 0xa4f   :  { %4818 = vrcp.f32 %v2012_v51 }
 0xa58   :  { %v4817_v52 = vpop.eup %4816 }
 0xa59   :  { %v4819_v54 = vpop.eup %4818  ;;  %v2017_v57 = vmul.f32 %v4817_v52, %v1996_v45 }
 0xa5a   :  { %v2018_v59 = vmul.f32 %v4819_v54, %v4480_v44  ;;  %v4154_v44 = vld [vmem:[#allocation2 + $0x59] ss:$0 sm:$0xff] }
 0xab0   :  { %v2024_v55 = vpop.permute.xlu1 %2023 }
 0xab1   :  { %v2022_v61 = vpop.permute.xlu0 %2021  ;;  %v2028_v7 = vmul.f32 %v2024_v55, %v2018_v59 }
 0xab2   :  { %v2027_v62 = vmul.f32 %v2022_v61, %v2017_v57 }
 0xab4   :  { %4497 = vmatprep.mubr.msk.f32.mxu0 %vm53_vm0, %v2027_v62  ;;  %v4872_v62 = vld [vmem:[#allocation2 + $0x48] sm:$0xff] }
 0xab5   :  { %4498 = vmatmul.mubr.msk.f32.vlgmr.msra.gmra.mrb[18].mxu0 %vm53_vm0, %v2028_v7 }
 0xab6   :  { %4524 = vmatprep.mubr.msk.f32.mxu0 %vm4908_vm4, %v4903_v15 }
 0xb88   :  { %v4499_v2 = vpop.f32.mrb[18].mxu0 }
 0xb89   :  { %v5251_v3 = vadd.f32 %v4499_v2, %v5228_v1  ;;  %v2109_v16 = vpop.f32.mrb[19].mxu0  ;;  %v2145_v1 = vld [vmem:[#allocation2 + $0x90] sm:$0xff] }
 0xb8a   :  { %v5254_v5 = vadd.f32 %v2109_v16, %v5231_v58  ;;  %v4711_v21 = vpack.c.bf16 %v2146_v20, %v2145_v1  ;;  %v2233_v58 = vld [vmem:[#allocation2 + $0xc0] sm:$0xff] }
 0xb8b   :  { %v2122_v6 = vmul.f32 %v5251_v3, %v5251_v3  ;;  %v4715_v26 = vpack.c.bf16 %v2234_v24, %v2233_v58 }
 0xb8c   :  { %v2121_v10 = vmul.f32 %v5254_v5, %v5254_v5  ;;  %4712 = vmatprep.subr.bf16.mxu1 %v4711_v21 }
 0xb8d   :  { %v2126_v22 = vsel %vm187_vm3, %v2122_v6, 0.0  ;;  %4714 = vmatpush3.bf16.msra.mxu1 %v4711_v21 }
 0xb8e   :  { %2127 = vadd.xlane.f32.xlu0 %v2126_v22  ;;  %v2123_v12 = vsel %vm187_vm3, %v2121_v10, 0.0  ;;  %4716 = vmatprep.subr.bf16.mxu1 %v4715_v26 }
 0xb8f   :  { %2124 = vadd.xlane.f32.xlu1 %v2123_v12 }
 0xc1b   :  { %v2128_v11 = vpop.xlane.xlu0 %2127 }
 0xc1c   :  { %v2130_v27 = vmul.f32 0.03125, %v2128_v11  ;;  %v2125_v28 = vpop.xlane.xlu1 %2124 }
 0xc1d   :  { %v2129_v25 = vmul.f32 0.03125, %v2125_v28 }
 0xc1e   :  { %v2132_v30 = vadd.f32 1e-06, %v2130_v27 }
 0xc1f   :  { %v2131_v18 = vadd.f32 1e-06, %v2129_v25 }
 0xc20   :  { %4820 = vrsqrt.f32 %v2132_v30 }
 0xc21   :  { %4822 = vrsqrt.f32 %v2131_v18 }
 0xc2a   :  { %v4821_v29 = vpop.eup %4820 }
 0xc2b   :  { %v4823_v31 = vpop.eup %4822  ;;  %v2136_v33 = vmul.f32 %v4821_v29, %v5251_v3 }
 0xc2c   :  { %v2135_v34 = vmul.f32 %v4823_v31, %v5254_v5 }
 0xc2d   :  { %v2142_v38 = vmul.f32 %v4153_v32, %v2136_v33 }
 0xc2e   :  { %v2141_v37 = vmul.f32 %v4153_v32, %v2135_v34 }
 0xc30   :  { %4508 = vmatprep.mubr.msk.f32.mxu1 %vm187_vm3, %v2141_v37 }
 0xc31   :  { %4509 = vmatmul.mubr.msk.f32.vlgmr.msra.gmra.mrb[24].mxu1 %vm187_vm3, %v2142_v38 }
 0xc32   :  { %4718 = vmatpush3.bf16.msra.mxu1 %v4715_v26  ;;  %4519 = vmatprep.mubr.msk.f32.mxu1 %vm187_vm3, %v2141_v37 }
 0xc33   :  { %4720 = vmatprep.subr.bf16.mxu1 %v4719_v39 }
 0xc36   :  { %4722 = vmatpush3.bf16.msra.mxu1 %v4719_v39 }
 0xc37   :  { %4527 = vmatprep.subr.mxu1 %v4903_v15 }
 0xc39   :  { %4520 = vmatmul.mubr.msk.f32.vlgmr.msra.gmra.mrb[26].mxu1 %vm187_vm3, %v2142_v38 }
 0xc3a   :  { %4529 = vmatprep.mubr.msk.f32.mxu1 %vm4908_vm4, %v4903_v15 }
 0xd04   :  { %v4510_v40 = vpop.f32.mrb[24].mxu1 }
 0xd05   :  { %v2224_v41 = vpop.f32.mrb[25].mxu1  ;;  %v5277_v51 = vadd.f32 %v4510_v40, %v4154_v44 }
 0xd06   :  { %v5272_v49 = vadd.f32 %v4154_v44, %v2224_v41 }
 0xd07   :  { %v2320_v54 = vmul.f32 %v5277_v51, %v5024_v19 }
 0xd08   :  { %v2319_v52 = vmul.f32 %v5272_v49, %v5012_v8  ;;  %v2331_v59 = vmul.f32 %v5272_v49, %v5000_v60  ;;  %v4873_v60 = vld [vmem:[#allocation2 + $0x40] sm:$0xff] }
 0xd09   :  { %v2317_v2 = vmul.f32 %v4873_v60, %v5272_v49 }
 0xd0c   :  { %v4521_v43 = vpop.f32.mrb[26].mxu1 }
 0xd0d   :  { %v2314_v45 = vadd.f32 %v4521_v43, %v4157_v42  ;;  %v2308_v46 = vpop.f32.mrb[27].mxu1 }
 0xd0e   :  { %v2309_v47 = vadd.f32 %v4157_v42, %v2308_v46 }
 0xd0f   :  { %v2334_v48 = vmul.f32 %v2314_v45, %v5002_v63  ;;  %v2332_v63 = vmul.f32 %v5277_v51, %v5004_v4  ;;  %v2318_v4 = vmul.f32 %v4872_v62, %v5277_v51 }
 0xd10   :  { %v2333_v50 = vmul.f32 %v2309_v47, %v4996_v56 }
 0xd11   :  { %2339 = vrot.lane.b32.xlu1 %v2334_v48, %s4905_s2 }
 0xd12   :  { %2337 = vrot.lane.b32.xlu0 %v2333_v50, %s4905_s2 }
 0xd16   :  { %2323 = vrot.lane.b32.xlu0 %v2319_v52, %s4905_s2 }
 0xd1a   :  { %2325 = vrot.lane.b32.xlu0 %v2320_v54, %s4905_s2 }
 0xd83   :  { %v2340_v56 = vpop.permute.xlu1 %2339 }
 0xd84   :  { %v2344_v55 = vadd.f32 %v2340_v56, %v2332_v63  ;;  %v2338_v57 = vpop.permute.xlu0 %2337 }
 0xd85   :  { %v2343_v8 = vadd.f32 %v2338_v57, %v2331_v59 }
 0xd86   :  { %2363 = vrot.lane.b32.xlu1 %v2344_v55, %s4907_s4  ;;  %2367 = vrot.lane.b32.xlu0 %v2344_v55, %s4909_s5 }
 0xd88   :  { %v2324_v61 = vpop.permute.xlu0 %2323 }
 0xd89   :  { %v2329_v16 = vadd.f32 %v2324_v61, %v2317_v2 }
 0xd8a   :  { %2361 = vrot.lane.b32.xlu1 %v2343_v8, %s4907_s4  ;;  %2371 = vrot.lane.b32.xlu0 %v2344_v55, %s4910_s6 }
 0xd8c   :  { %v2326_v19 = vpop.permute.xlu0 %2325 }
 0xd8d   :  { %v2330_v7 = vadd.f32 %v2326_v19, %v2318_v4 }
 0xd8e   :  { %2365 = vrot.lane.b32.xlu1 %v2343_v8, %s4909_s5  ;;  %2463 = vrot.lane.b32.xlu0 %v2344_v55, %s4904_s0 }
 0xd92   :  { %2369 = vrot.lane.b32.xlu1 %v2343_v8, %s4910_s6  ;;  %2349 = vrot.lane.b32.xlu0 %v2330_v7, %s4907_s4 }
 0xd96   :  { %2353 = vrot.lane.b32.xlu0 %v2330_v7, %s4909_s5  ;;  %2347 = vrot.lane.b32.xlu1 %v2329_v16, %s4907_s4 }
 0xd9a   :  { %2351 = vrot.lane.b32.xlu1 %v2329_v16, %s4909_s5 }
 0xd9e   :  { %2387 = vrot.lane.b32.xlu1 %v2343_v8, %s4904_s0 }
 0xdf8   :  { %v2364_v6 = vpop.permute.xlu1 %2363  ;;  %v2368_v10 = vpop.permute.xlu0 %2367 }
 0xdf9   :  { %2615 = vrot.lane.b32.xlu0 %v2364_v6, %s4904_s0 }
 0xdfc   :  { %v2362_v22 = vpop.permute.xlu1 %2361  ;;  %v2372_v12 = vpop.permute.xlu0 %2371 }
 0xdfd   :  { %2767 = vrot.lane.b32.xlu0 %v2368_v10, %s4904_s0  ;;  %2539 = vrot.lane.b32.xlu1 %v2362_v22, %s4904_s0 }
 0xe00   :  { %v2366_v13 = vpop.permute.xlu1 %2365  ;;  %v2464_v0 = vpop.permute.xlu0 %2463 }
 0xe01   :  { %2919 = vrot.lane.b32.xlu0 %v2372_v12, %s4904_s0  ;;  %4528 = vmatpush3.xpose.msk.msra.mxu1 %vm475_vm5, %v2464_v0 }
 0xe02   :  { %2691 = vrot.lane.b32.xlu1 %v2366_v13, %s4904_s0  ;;  %4537 = vmatprep.subr.mxu1 %v4903_v15 }
 0xe04   :  { %v2370_v1 = vpop.permute.xlu1 %2369  ;;  %4530 = vmatmul.mubr.msk.f32.vlgmr.msra.gmra.mrb[28].mxu1 %vm475_vm5, %v2330_v7  ;;  %v2350_v58 = vpop.permute.xlu0 %2349 }
 0xe05   :  { %2357 = vrot.lane.b32.xlu0 %v2330_v7, %s4910_s6  ;;  %4539 = vmatprep.mubr.msk.f32.mxu1 %vm4908_vm4, %v4903_v15 }
 0xe06   :  { %2843 = vrot.lane.b32.xlu1 %v2370_v1, %s4904_s0 }
 0xe08   :  { %v2348_v23 = vpop.permute.xlu1 %2347  ;;  %v2354_v24 = vpop.permute.xlu0 %2353 }
 0xe0a   :  { %2355 = vrot.lane.b32.xlu1 %v2329_v16, %s4910_s6 }
 0xe0c   :  { %v2352_v20 = vpop.permute.xlu1 %2351 }
 0xe10   :  { %v2388_v21 = vpop.permute.xlu1 %2387 }
 0xe11   :  { %4523 = vmatpush3.xpose.msk.msra.mxu0 %vm475_vm5, %v2388_v21 }
 0xe12   :  { %4532 = vmatprep.subr.mxu0 %v4903_v15 }
 0xe14   :  { %4525 = vmatmul.mubr.msk.f32.vlgmr.msra.gmra.mrb[20].mxu0 %vm475_vm5, %v2329_v16 }
 0xe15   :  { %4534 = vmatprep.mubr.msk.f32.mxu0 %vm4908_vm4, %v4903_v15 }
 0xe6b   :  { %v2616_v26 = vpop.permute.xlu0 %2615 }
 0xe6c   :  { %4538 = vmatpush3.xpose.msk.msra.mxu1 %vm475_vm5, %v2616_v26 }
 0xe6d   :  { %4547 = vmatprep.subr.mxu1 %v4903_v15 }
 0xe6f   :  { %4540 = vmatmul.mubr.msk.f32.vlgmr.msra.gmra.mrb[30].mxu1 %vm475_vm5, %v2350_v58  ;;  %v2768_v11 = vpop.permute.xlu0 %2767  ;;  %v2540_v27 = vpop.permute.xlu1 %2539 }
 0xe70   :  { %4533 = vmatpush3.xpose.msk.msra.mxu0 %vm475_vm5, %v2540_v27  ;;  %4548 = vmatpush3.xpose.msk.msra.mxu1 %vm475_vm5, %v2768_v11 }
 0xe71   :  { %4549 = vmatprep.mubr.msk.f32.mxu1 %vm4908_vm4, %v4903_v15  ;;  %4557 = vmatprep.subr.mxu1 %v4903_v15 }
 0xe72   :  { %4542 = vmatprep.subr.mxu0 %v4903_v15 }
 0xe73   :  { %4550 = vmatmul.mubr.msk.f32.vlgmr.msra.gmra.mrb[32].mxu1 %vm475_vm5, %v2354_v24  ;;  %v2920_v28 = vpop.permute.xlu0 %2919  ;;  %4535 = vmatmul.mubr.msk.f32.vlgmr.msra.gmra.mrb[22].mxu0 %vm475_vm5, %v2348_v23 }
 0xe74   :  { %v2692_v25 = vpop.permute.xlu1 %2691  ;;  %4558 = vmatpush3.xpose.msk.msra.mxu1 %vm475_vm5, %v2920_v28  ;;  %4544 = vmatprep.mubr.msk.f32.mxu0 %vm4908_vm4, %v4903_v15 }
 0xe75   :  { %4543 = vmatpush3.xpose.msk.msra.mxu0 %vm475_vm5, %v2692_v25  ;;  %4559 = vmatprep.mubr.msk.f32.mxu1 %vm4908_vm4, %v4903_v15 }
 0xe76   :  { %4552 = vmatprep.subr.mxu0 %v4903_v15  ;;  %4567 = vmatprep.subr.mxu1 %v4903_v15 }
 0xe77   :  { %v2358_v30 = vpop.permute.xlu0 %2357 }
 0xe78   :  { %4545 = vmatmul.mubr.msk.f32.vlgmr.msra.gmra.mrb[24].mxu0 %vm475_vm5, %v2352_v20  ;;  %v2844_v18 = vpop.permute.xlu1 %2843  ;;  %4560 = vmatmul.mubr.msk.f32.vlgmr.msra.gmra.mrb[34].mxu1 %vm475_vm5, %v2358_v30 }
 0xe79   :  { %4553 = vmatpush3.xpose.msk.msra.mxu0 %vm475_vm5, %v2844_v18  ;;  %4554 = vmatprep.mubr.msk.f32.mxu0 %vm4908_vm4, %v4903_v15 }
 0xe7a   :  { %4562 = vmatprep.subr.mxu0 %v4903_v15  ;;  %4569 = vmatprep.mubr.msk.f32.mxu1 %vm4908_vm4, %v4903_v15 }
 0xe7c   :  { %v2356_v29 = vpop.permute.xlu1 %2355 }
 0xe7d   :  { %4555 = vmatmul.mubr.msk.f32.vlgmr.msra.gmra.mrb[26].mxu0 %vm475_vm5, %v2356_v29 }
 0xe7e   :  { %4564 = vmatprep.mubr.msk.f32.mxu0 %vm4908_vm4, %v4903_v15 }
 0xed7   :  { %v2535_v31 = vpop.f32.mrb[28].mxu1 }
 0xed8   :  { %v5352_v32 = vadd.f32 %v2535_v31, %v5109_v9  ;;  %v4531_v33 = vpop.f32.mrb[29].mxu1 }
 0xeda   :  { %v2998_v34 = vsel %vm475_vm5, %v5352_v32, -inf }
 0xedb   :  { %2999 = vmax.xlane.f32.xlu0 %v2998_v34 }
 0xee7   :  { %v2459_v35 = vpop.f32.mrb[20].mxu0 }
 0xee8   :  { %v5357_v36 = vadd.f32 %v2459_v35, %v5116_v14  ;;  %v4526_v37 = vpop.f32.mrb[21].mxu0 }
 0xeea   :  { %v2995_v38 = vsel %vm475_vm5, %v5357_v36, -inf }
 0xeeb   :  { %2996 = vmax.xlane.f32.xlu1 %v2995_v38 }
 0xf42   :  { %v2687_v39 = vpop.f32.mrb[30].mxu1 }
 0xf43   :  { %v5362_v40 = vadd.f32 %v2687_v39, %v5109_v9  ;;  %v4541_v41 = vpop.f32.mrb[31].mxu1 }
 0xf45   :  { %v3004_v42 = vsel %vm475_vm5, %v5362_v40, -inf }
 0xf46   :  { %v2839_v43 = vpop.f32.mrb[32].mxu1  ;;  %3005 = vmax.xlane.f32.xlu1 %v3004_v42  ;;  %v2611_v44 = vpop.f32.mrb[22].mxu0 }
 0xf47   :  { %v5367_v45 = vadd.f32 %v2839_v43, %v5109_v9  ;;  %v2612_v46 = vadd.f32 %v2611_v44, %v5116_v14  ;;  %v4536_v47 = vpop.f32.mrb[23].mxu0  ;;  %v4551_v48 = vpop.f32.mrb[33].mxu1 }
 0xf49   :  { %v3010_v50 = vsel %vm475_vm5, %v5367_v45, -inf  ;;  %v3001_v52 = vsel %vm475_vm5, %v2612_v46, -inf }
 0xf4a   :  { %3011 = vmax.xlane.f32.xlu1 %v3010_v50  ;;  %3002 = vmax.xlane.f32.xlu0 %v3001_v52 }
 0xf4b   :  { %v2763_v54 = vpop.f32.mrb[24].mxu0  ;;  %v2991_v63 = vpop.f32.mrb[34].mxu1 }
 0xf4c   :  { %v2764_v56 = vadd.f32 %v2763_v54, %v5116_v14  ;;  %v4546_v55 = vpop.f32.mrb[25].mxu0  ;;  %v5375_v57 = vadd.f32 %v2991_v63, %v5109_v9  ;;  %v4561_v59 = vpop.f32.mrb[35].mxu1 }
 0xf4e   :  { %v3007_v8 = vsel %vm475_vm5, %v2764_v56, -inf  ;;  %v3016_v61 = vsel %vm475_vm5, %v5375_v57, -inf }
 0xf4f   :  { %3008 = vmax.xlane.f32.xlu0 %v3007_v8  ;;  %3017 = vmax.xlane.f32.xlu1 %v3016_v61 }
 0xf50   :  { %v2915_v19 = vpop.f32.mrb[26].mxu0 }
 0xf51   :  { %v2916_v62 = vadd.f32 %v2915_v19, %v5116_v14  ;;  %v4556_v4 = vpop.f32.mrb[27].mxu0 }
 0xf53   :  { %v3013_v7 = vsel %vm475_vm5, %v2916_v62, -inf }
 0xf54   :  { %3014 = vmax.xlane.f32.xlu0 %v3013_v7 }
 0xf60   :  { %2377 = vrot.lane.b32.xlu1 %v5277_v51, %s4907_s4 }
 0xf64   :  { %2379 = vrot.lane.b32.xlu1 %v5272_v49, %s4909_s5 }
 0xf68   :  { %2383 = vrot.lane.b32.xlu1 %v5272_v49, %s4910_s6  ;;  %v3000_v14 = vpop.xlane.xlu0 %2999 }
 0xf69   :  { %v3020_v21 = vsub.f32 %v5352_v32, %v3000_v14 }
 0xf6a   :  { %2375 = vrot.lane.b32.xlu0 %v5272_v49, %s4907_s4 }
 0xf6b   :  { %v3029_v58 = vmul.f32 1.442695, %v3020_v21 }
 0xf6c   :  { %3159 = vrot.lane.b32.xlu1 %v5277_v51, %s4906_s30 }
 0xf6d   :  { %4824 = vpow2.f32 %v3029_v58 }
 0xf6e   :  { %2381 = vrot.lane.b32.xlu0 %v5277_v51, %s4909_s5 }
 0xf72   :  { %2385 = vrot.lane.b32.xlu0 %v5277_v51, %s4910_s6 }
 0xf76   :  { %3083 = vrot.lane.b32.xlu0 %v5272_v49, %s4906_s30 }
 0xf77   :  { %v4825_v35 = vpop.eup %4824 }
 0xf78   :  { %v2997_v9 = vpop.xlane.xlu1 %2996  ;;  %v3046_v37 = vsel %vm475_vm5, %v4825_v35, 0.0 }
 0xf79   :  { %v3019_v26 = vsub.f32 %v5357_v36, %v2997_v9 }
 0xf7b   :  { %v3027_v28 = vmul.f32 1.442695, %v3019_v26  ;;  %v3721_v26 = vld [vmem:[#allocation2 + $0x100] sm:$0xff] }
 0xfd3   :  { %v3006_v60 = vpop.xlane.xlu1 %3005 }
 0xfd4   :  { %v3022_v25 = vsub.f32 %v5362_v40, %v3006_v60 }
 0xfd6   :  { %v3033_v29 = vmul.f32 1.442695, %v3022_v25 }
 0xfd7   :  { %v3003_v2 = vpop.xlane.xlu0 %3002  ;;  %v3012_v16 = vpop.xlane.xlu1 %3011 }
 0xfd8   :  { %v3021_v24 = vsub.f32 %v2612_v46, %v3003_v2  ;;  %v3024_v31 = vsub.f32 %v5367_v45, %v3012_v16 }
 0xfda   :  { %v3031_v11 = vmul.f32 1.442695, %v3021_v24  ;;  %v3037_v33 = vmul.f32 1.442695, %v3024_v31 }
 0xfdc   :  { %v3009_v6 = vpop.xlane.xlu0 %3008  ;;  %v3018_v10 = vpop.xlane.xlu1 %3017  ;;  %4826 = vpow2.f32 %v3031_v11  ;;  %v3722_v11 = vld [vmem:[#allocation2 + $0x108] sm:$0xff] }
 0xfdd   :  { %v3023_v27 = vsub.f32 %v2764_v56, %v3009_v6  ;;  %4828 = vpow2.f32 %v3027_v28  ;;  %v3026_v34 = vsub.f32 %v5375_v57, %v3018_v10 }
 0xfdf   :  { %v3035_v30 = vmul.f32 1.442695, %v3023_v27  ;;  %v3041_v36 = vmul.f32 1.442695, %v3026_v34  ;;  %v4723_v27 = vpack.c.bf16 %v3722_v11, %v3721_v26  ;;  %v3941_v26 = vld [vmem:[#allocation2 + $0x1a8] sm:$0xff]  ;;  %v3942_v11 = vld [vmem:[#allocation2 + $0x1b0] sm:$0xff] }
 0xfe0   :  { %v2378_v22 = vpop.permute.xlu1 %2377 }
 0xfe1   :  { %v3015_v12 = vpop.xlane.xlu0 %3014  ;;  %3311 = vrot.lane.b32.xlu0 %v2378_v22, %s4906_s30  ;;  %4830 = vpow2.f32 %v3035_v30  ;;  %v3723_v30 = vld [vmem:[#allocation2 + $0x110] sm:$0xff] }
 0xfe2   :  { %v3025_v18 = vsub.f32 %v2916_v62, %v3015_v12  ;;  %4832 = vpow2.f32 %v3033_v29 }
 0xfe4   :  { %v2380_v13 = vpop.permute.xlu1 %2379  ;;  %v3039_v32 = vmul.f32 1.442695, %v3025_v18  ;;  %v3724_v18 = vld [vmem:[#allocation2 + $0x118] sm:$0xff] }
 0xfe5   :  { %v2376_v0 = vpop.permute.xlu0 %2375  ;;  %v4727_v29 = vpack.c.bf16 %v3724_v18, %v3723_v30  ;;  %v3944_v30 = vld [vmem:[#allocation2 + $0x1c0] sm:$0xff]  ;;  %v3945_v18 = vld [vmem:[#allocation2 + $0x1c8] sm:$0xff] }
 0xfe6   :  { %3235 = vrot.lane.b32.xlu1 %v2376_v0, %s4906_s30  ;;  %4834 = vpow2.f32 %v3039_v32  ;;  %v4827_v38 = vpop.eup %4826 }
 0xfe7   :  { %4836 = vpow2.f32 %v3037_v33  ;;  %v4829_v39 = vpop.eup %4828  ;;  %v3049_v40 = vsel %vm475_vm5, %v4827_v38, 0.0 }
 0xfe8   :  { %v2384_v1 = vpop.permute.xlu1 %2383  ;;  %4838 = vpow2.f32 %v3041_v36  ;;  %v3043_v42 = vsel %vm475_vm5, %v4829_v39, 0.0 }
 0xfe9   :  { %v2382_v51 = vpop.permute.xlu0 %2381 }
 0xfea   :  { %3463 = vrot.lane.b32.xlu0 %v2382_v51, %s4906_s30  ;;  %3387 = vrot.lane.b32.xlu1 %v2380_v13, %s4906_s30 }
 0xfeb   :  { %v4831_v41 = vpop.eup %4830 }
 0xfec   :  { %v3160_v49 = vpop.permute.xlu1 %3159  ;;  %v4833_v43 = vpop.eup %4832  ;;  %v3055_v44 = vsel %vm475_vm5, %v4831_v41, 0.0 }
 0xfed   :  { %v2386_v23 = vpop.permute.xlu0 %2385  ;;  %4568 = vmatpush3.msra.mxu1 %v3160_v49  ;;  %v3052_v46 = vsel %vm475_vm5, %v4833_v43, 0.0 }
 0xfee   :  { %4577 = vmatprep.subr.mxu1 %v4903_v15 }
 0xff0   :  { %v5413_v45 = vpop.eup %4834 }
 0xff1   :  { %v3084_v20 = vpop.permute.xlu0 %3083  ;;  %v4837_v47 = vpop.eup %4836  ;;  %v3061_v48 = vsel %vm475_vm5, %v5413_v45, 0.0 }
 0xff2   :  { %4563 = vmatpush3.msra.mxu0 %v3084_v20  ;;  %v3058_v50 = vsel %vm475_vm5, %v4837_v47, 0.0  ;;  %v5419_v52 = vpop.eup %4838 }
 0xff3   :  { %4572 = vmatprep.subr.mxu0 %v4903_v15  ;;  %v3064_v54 = vsel %vm475_vm5, %v5419_v52, 0.0 }
0x1009   :  { %3047 = vadd.xlane.f32.xlu0 %v3046_v37 }
0x100d   :  { %3050 = vadd.xlane.f32.xlu0 %v3049_v40 }
0x100e   :  { %3044 = vadd.xlane.f32.xlu1 %v3043_v42 }
0x1011   :  { %3056 = vadd.xlane.f32.xlu0 %v3055_v44 }
0x1012   :  { %3053 = vadd.xlane.f32.xlu1 %v3052_v46 }
0x1015   :  { %3062 = vadd.xlane.f32.xlu0 %v3061_v48 }
0x1016   :  { %3059 = vadd.xlane.f32.xlu1 %v3058_v50 }
0x101a   :  { %3065 = vadd.xlane.f32.xlu1 %v3064_v54 }
0x102b   :  { %3615 = vrot.lane.b32.xlu0 %v2386_v23, %s4906_s30  ;;  %3539 = vrot.lane.b32.xlu1 %v2384_v1, %s4906_s30 }
0x1053   :  { %v3312_v63 = vpop.permute.xlu0 %3311 }
0x1058   :  { %v3236_v56 = vpop.permute.xlu1 %3235 }
0x105c   :  { %v3464_v55 = vpop.permute.xlu0 %3463  ;;  %v3388_v59 = vpop.permute.xlu1 %3387 }
0x1096   :  { %v3048_v57 = vpop.xlane.xlu0 %3047 }
0x1097   :  { %4840 = vrcp.f32 %v3048_v57 }
0x109a   :  { %v3051_v8 = vpop.xlane.xlu0 %3050 }
0x109b   :  { %v3045_v61 = vpop.xlane.xlu1 %3044 }
0x109c   :  { %4842 = vrcp.f32 %v3045_v61 }
0x109d   :  { %4844 = vrcp.f32 %v3051_v8 }
0x109e   :  { %v3057_v19 = vpop.xlane.xlu0 %3056 }
0x109f   :  { %v3054_v62 = vpop.xlane.xlu1 %3053 }
0x10a0   :  { %4846 = vrcp.f32 %v3054_v62 }
0x10a1   :  { %v4841_v4 = vpop.eup %4840  ;;  %4848 = vrcp.f32 %v3057_v19 }
0x10a2   :  { %v3070_v7 = vmul.f32 %v4841_v4, %v4825_v35  ;;  %v3063_v9 = vpop.xlane.xlu0 %3062 }
0x10a3   :  { %v3060_v14 = vpop.xlane.xlu1 %3059 }
0x10a4   :  { %4850 = vrcp.f32 %v3060_v14  ;;  %4570 = vmatmul.mubr.msk.f32.vlgmr.msra.gmra.mrb[36].mxu1 %vm475_vm5, %v3070_v7  ;;  %v3831_v14 = vld [vmem:[#allocation2 + $0x140] sm:$0xff] }
0x10a5   :  { %4578 = vmatpush3.msra.mxu1 %v3312_v63  ;;  %4579 = vmatprep.mubr.msk.f32.mxu1 %vm4908_vm4, %v4903_v15  ;;  %4852 = vrcp.f32 %v3063_v9 }
0x10a6   :  { %v4843_v60 = vpop.eup %4842  ;;  %4587 = vmatprep.subr.mxu1 %v4903_v15  ;;  %v3616_v23 = vpop.permute.xlu0 %3615 }
0x10a7   :  { %v3068_v2 = vmul.f32 %v4843_v60, %v4829_v39  ;;  %v3066_v16 = vpop.xlane.xlu1 %3065  ;;  %v4845_v6 = vpop.eup %4844  ;;  %v3832_v60 = vld [vmem:[#allocation2 + $0x148] sm:$0xff] }
0x10a8   :  { %4854 = vrcp.f32 %v3066_v16  ;;  %v3072_v22 = vmul.f32 %v4845_v6, %v4827_v38  ;;  %v3834_v16 = vld [vmem:[#allocation2 + $0x158] sm:$0xff] }
0x10a9   :  { %4565 = vmatmul.mubr.msk.f32.vlgmr.msra.gmra.mrb[28].mxu0 %vm475_vm5, %v3068_v2  ;;  %v4731_v2 = vpack.c.bf16 %v3832_v60, %v3831_v14 }
0x10aa   :  { %v4847_v10 = vpop.eup %4846  ;;  %4573 = vmatpush3.msra.mxu0 %v3236_v56  ;;  %4574 = vmatprep.mubr.msk.f32.mxu0 %vm4908_vm4, %v4903_v15 }
0x10ab   :  { %v3074_v12 = vmul.f32 %v4847_v10, %v4833_v43  ;;  %4582 = vmatprep.subr.mxu0 %v4903_v15  ;;  %v4849_v13 = vpop.eup %4848  ;;  %v3540_v20 = vpop.permute.xlu1 %3539 }
0x10ac   :  { %v3076_v1 = vmul.f32 %v4849_v13, %v4831_v41 }
0x10ad   :  { %4575 = vmatmul.mubr.msk.f32.vlgmr.msra.gmra.mrb[30].mxu0 %vm475_vm5, %v3072_v22  ;;  %4580 = vmatmul.mubr.msk.f32.vlgmr.msra.gmra.mrb[38].mxu1 %vm475_vm5, %v3074_v12 }
0x10ae   :  { %v4851_v0 = vpop.eup %4850  ;;  %4583 = vmatpush3.msra.mxu0 %v3388_v59  ;;  %4588 = vmatpush3.msra.mxu1 %v3464_v55 }
0x10af   :  { %v3078_v51 = vmul.f32 %v4851_v0, %v4837_v47  ;;  %4584 = vmatprep.mubr.msk.f32.mxu0 %vm4908_vm4, %v4903_v15  ;;  %4589 = vmatprep.mubr.msk.f32.mxu1 %vm4908_vm4, %v4903_v15  ;;  %v4853_v49 = vpop.eup %4852 }
0x10b0   :  { %4592 = vmatprep.subr.mxu0 %v4903_v15  ;;  %4597 = vmatprep.subr.mxu1 %v4903_v15  ;;  %v3080_v58 = vmul.f32 %v4853_v49, %v5413_v45  ;;  %v4186_v49 = vld [vmem:[#allocation2 + $0x53] ss:$0 sm:$0xff] }
0x10b1   :  { %4585 = vmatmul.mubr.msk.f32.vlgmr.msra.gmra.mrb[32].mxu0 %vm475_vm5, %v3076_v1  ;;  %4590 = vmatmul.mubr.msk.f32.vlgmr.msra.gmra.mrb[40].mxu1 %vm475_vm5, %v3078_v51 }
0x10b2   :  { %v4855_v21 = vpop.eup %4854  ;;  %4593 = vmatpush3.msra.mxu0 %v3540_v20  ;;  %4598 = vmatpush3.msra.mxu1 %v3616_v23 }
0x10b3   :  { %v3082_v24 = vmul.f32 %v4855_v21, %v5419_v52  ;;  %4594 = vmatprep.mubr.msk.f32.mxu0 %vm4908_vm4, %v4903_v15  ;;  %4599 = vmatprep.mubr.msk.f32.mxu1 %vm4908_vm4, %v4903_v15  ;;  %vm4102_vm4 = vcmask 1024  }
0x10b4   :  { %4724 = vmatprep.subr.bf16.mxu0 %v4723_v27  ;;  %4732 = vmatprep.subr.bf16.mxu1 %v4731_v2 }
0x10b5   :  { %4595 = vmatmul.mubr.msk.f32.vlgmr.msra.gmra.mrb[34].mxu0 %vm475_vm5, %v3080_v58  ;;  %4600 = vmatmul.mubr.msk.f32.vlgmr.msra.gmra.mrb[42].mxu1 %vm475_vm5, %v3082_v24  ;;  %v3940_v24 = vld [vmem:[#allocation2 + $0x1a0] sm:$0xff] }
0x10b6   :  { %4726 = vmatpush3.bf16.msra.mxu0 %v4723_v27  ;;  %4734 = vmatpush3.bf16.msra.mxu1 %v4731_v2  ;;  %v4739_v27 = vpack.c.bf16 %v3941_v26, %v3940_v24 }
0x10b7   :  { %4728 = vmatprep.subr.bf16.mxu0 %v4727_v29 }
0x10ba   :  { %4730 = vmatpush3.bf16.msra.mxu0 %v4727_v29  ;;  %v4747_v29 = vpack.c.bf16 %v3945_v18, %v3944_v30 }
0x10bb   :  { %4740 = vmatprep.subr.bf16.mxu0 %v4739_v27 }
0x1177   :  { %v3231_v28 = vpop.f32.mrb[36].mxu1 }
0x1178   :  { %v4571_v25 = vpop.f32.mrb[37].mxu1 }
0x117c   :  { %v3155_v31 = vpop.f32.mrb[28].mxu0 }
0x117d   :  { %v4566_v32 = vpop.f32.mrb[29].mxu0 }
0x117e   :  { %v3947_v32 = vld [vmem:[#allocation2 + $0x1d8] sm:$0xff] }
0x1180   :  { %v3307_v33 = vpop.f32.mrb[30].mxu0  ;;  %v3383_v15 = vpop.f32.mrb[38].mxu1 }
0x1181   :  { %3693 = vrot.lane.b32.xlu1 %v3307_v33, %s4901_s23  ;;  %v4576_v34 = vpop.f32.mrb[31].mxu0  ;;  %3695 = vrot.lane.b32.xlu0 %v3383_v15, %s4901_s23  ;;  %v4581_v35 = vpop.f32.mrb[39].mxu1 }
0x1184   :  { %v3459_v36 = vpop.f32.mrb[32].mxu0  ;;  %v3535_v37 = vpop.f32.mrb[40].mxu1 }
0x1185   :  { %3701 = vrot.lane.b32.xlu1 %v3459_v36, %s4913_s9  ;;  %v4586_v38 = vpop.f32.mrb[33].mxu0  ;;  %3703 = vrot.lane.b32.xlu0 %v3535_v37, %s4913_s9  ;;  %v4591_v39 = vpop.f32.mrb[41].mxu1 }
0x1188   :  { %v3611_v40 = vpop.f32.mrb[34].mxu0  ;;  %v3687_v41 = vpop.f32.mrb[42].mxu1 }
0x1189   :  { %3711 = vrot.lane.b32.xlu0 %v3687_v41, %s4914_s10  ;;  %v4601_v42 = vpop.f32.mrb[43].mxu1  ;;  %3709 = vrot.lane.b32.xlu1 %v3611_v40, %s4914_s10  ;;  %v4596_v43 = vpop.f32.mrb[35].mxu0 }
0x11f3   :  { %v3696_v44 = vpop.permute.xlu0 %3695  ;;  %v3694_v45 = vpop.permute.xlu1 %3693 }
0x11f4   :  { %v3716_v48 = vsel %vm475_vm5, %v3231_v28, %v3696_v44  ;;  %v3715_v50 = vsel %vm475_vm5, %v3155_v31, %v3694_v45  ;;  %v3943_v28 = vld [vmem:[#allocation2 + $0x1b8] sm:$0xff]  ;;  %v3946_v31 = vld [vmem:[#allocation2 + $0x1d0] sm:$0xff] }
0x11f5   :  { %v4743_v25 = vpack.c.bf16 %v3943_v28, %v3942_v11  ;;  %v4751_v33 = vpack.c.bf16 %v3947_v32, %v3946_v31 }
0x11f7   :  { %v3704_v46 = vpop.permute.xlu0 %3703  ;;  %v3702_v47 = vpop.permute.xlu1 %3701 }
0x11f8   :  { %v3718_v52 = vsel %vm1804_vm14, %v3716_v48, %v3704_v46  ;;  %v3717_v54 = vsel %vm1804_vm14, %v3715_v50, %v3702_v47 }
0x11fb   :  { %v3712_v63 = vpop.permute.xlu0 %3711  ;;  %v3710_v56 = vpop.permute.xlu1 %3709 }
0x11fc   :  { %v3720_v55 = vsel %vm1807_vm15, %v3718_v52, %v3712_v63  ;;  %v3719_v57 = vsel %vm1807_vm15, %v3717_v54, %v3710_v56 }
0x11fd   :  { %4610 = vmatprep.mubr.msk.f32.mxu0 %vm187_vm3, %v3719_v57 }
0x11fe   :  { %4611 = vmatmul.mubr.msk.f32.vlgmr.msra.gmra.mrb[36].mxu0 %vm187_vm3, %v3720_v55 }
0x11ff   :  { %4742 = vmatpush3.bf16.msra.mxu0 %v4739_v27 }
0x1200   :  { %4744 = vmatprep.subr.bf16.mxu0 %v4743_v25 }
0x1203   :  { %4746 = vmatpush3.bf16.msra.mxu0 %v4743_v25  ;;  %v4089_v25 = vsub.s32 %v4957_v17, %v5100_v53 }
0x1204   :  { %4748 = vmatprep.subr.bf16.mxu0 %v4747_v29 }
0x1207   :  { %4750 = vmatpush3.bf16.msra.mxu0 %v4747_v29 }
0x1208   :  { %4752 = vmatprep.subr.bf16.mxu0 %v4751_v33 }
0x120b   :  { %4754 = vmatpush3.bf16.msra.mxu0 %v4751_v33 }
0x12d1   :  { %v4612_v59 = vpop.f32.mrb[36].mxu0 }
0x12d2   :  { %v5466_v8 = vadd.f32 %v4612_v59, %v5251_v3  ;;  %v3797_v61 = vpop.f32.mrb[37].mxu0  ;;  %v3833_v3 = vld [vmem:[#allocation2 + $0x150] sm:$0xff] }
0x12d3   :  { %v5469_v19 = vadd.f32 %v3797_v61, %v5254_v5  ;;  %v4735_v6 = vpack.c.bf16 %v3834_v16, %v3833_v3  ;;  %v4874_v61 = vld [vmem:[%s5503_s1] sm:$0x3] }
0x12d4   :  { %v3810_v62 = vmul.f32 %v5466_v8, %v5466_v8 }
0x12d5   :  { %v3809_v4 = vmul.f32 %v5469_v19, %v5469_v19  ;;  %4736 = vmatprep.subr.bf16.mxu1 %v4735_v6 }
0x12d6   :  { %v3814_v7 = vsel %vm187_vm3, %v3810_v62, 0.0  ;;  %4738 = vmatpush3.bf16.msra.mxu1 %v4735_v6  ;;  %v4068_v62 = vsel %vm4067_vm1, %v4874_v61, 0 }
0x12d7   :  { %3815 = vadd.xlane.f32.xlu0 %v3814_v7  ;;  %v3811_v9 = vsel %vm187_vm3, %v3809_v4, 0.0  ;;  %v4070_v4 = vshrl.u32 %v4068_v62, 16 }
0x12d8   :  { %3812 = vadd.xlane.f32.xlu1 %v3811_v9 }
0x12d9   :  { %v4072_v7 = vcvt.s32.f32 %v4070_v4 }
0x1364   :  { %v3816_v5 = vpop.xlane.xlu0 %3815 }
0x1365   :  { %v3818_v10 = vmul.f32 0.03125, %v3816_v5  ;;  %v3813_v22 = vpop.xlane.xlu1 %3812  ;;  %v4193_v5 = vld [vmem:[#allocation2 + $0x54] ss:$0 sm:$0xff] }
0x1366   :  { %v3817_v12 = vmul.f32 0.03125, %v3813_v22 }
0x1367   :  { %v3820_v13 = vadd.f32 1e-06, %v3818_v10 }
0x1368   :  { %v3819_v0 = vadd.f32 1e-06, %v3817_v12  ;;  %v4194_v12 = vld [vmem:[#allocation2 + $0x55] ss:$0 sm:$0xff] }
0x1369   :  { %4856 = vrsqrt.f32 %v3820_v13 }
0x136a   :  { %4858 = vrsqrt.f32 %v3819_v0 }
0x1373   :  { %v4857_v1 = vpop.eup %4856 }
0x1374   :  { %v4859_v51 = vpop.eup %4858  ;;  %v3824_v23 = vmul.f32 %v4857_v1, %v5466_v8 }
0x1375   :  { %v3823_v20 = vmul.f32 %v4859_v51, %v5469_v19 }
0x1376   :  { %v3830_v58 = vmul.f32 %v4186_v49, %v3824_v23 }
0x1377   :  { %v3829_v21 = vmul.f32 %v4186_v49, %v3823_v20 }
0x1379   :  { %4621 = vmatprep.mubr.msk.f32.mxu1 %vm187_vm3, %v3829_v21 }
0x137a   :  { %4622 = vmatmul.mubr.msk.f32.vlgmr.msra.gmra.mrb[44].mxu1 %vm187_vm3, %v3830_v58 }
0x144d   :  { %v4623_v15 = vpop.f32.mrb[44].mxu1 }
0x144e   :  { %3934 = vrot.lane.b32.xlu1 %v4623_v15, %s4906_s30  ;;  %v3907_v34 = vpop.f32.mrb[45].mxu1  ;;  %v4190_v36 = vmul.f32 -1.442695, %v4623_v15 }
0x144f   :  { %3932 = vrot.lane.b32.xlu0 %v3907_v34, %s4906_s30  ;;  %v4189_v35 = vmul.f32 -1.442695, %v3907_v34 }
0x1451   :  { %4860 = vpow2.f32 %v4189_v35 }
0x1452   :  { %4862 = vpow2.f32 %v4190_v36 }
0x145b   :  { %v4861_v37 = vpop.eup %4860 }
0x145c   :  { %v4863_v38 = vpop.eup %4862  ;;  %v3922_v39 = vadd.f32 1.0, %v4861_v37 }
0x145d   :  { %v3923_v40 = vadd.f32 1.0, %v4863_v38 }
0x145e   :  { %4864 = vrcp.f32 %v3922_v39 }
0x145f   :  { %4866 = vrcp.f32 %v3923_v40 }
0x1468   :  { %v4865_v41 = vpop.eup %4864 }
0x1469   :  { %v4867_v42 = vpop.eup %4866  ;;  %v3928_v43 = vmul.f32 %v4865_v41, %v3907_v34 }
0x146a   :  { %v3929_v45 = vmul.f32 %v4867_v42, %v4623_v15 }
0x14c0   :  { %v3935_v44 = vpop.permute.xlu1 %3934 }
0x14c1   :  { %v3933_v46 = vpop.permute.xlu0 %3932  ;;  %v3939_v48 = vmul.f32 %v3935_v44, %v3929_v45 }
0x14c2   :  { %v3938_v47 = vmul.f32 %v3933_v46, %v3928_v43 }
0x14c4   :  { %4640 = vmatprep.mubr.msk.f32.mxu0 %vm53_vm0, %v3938_v47 }
0x14c5   :  { %4641 = vmatmul.mubr.msk.f32.vlgmr.msra.gmra.mrb[38].mxu0 %vm53_vm0, %v3939_v48 }
0x1598   :  { %v4642_v50 = vpop.f32.mrb[38].mxu0 }
0x1599   :  { %v4030_v52 = vadd.f32 %v4642_v50, %v5466_v8  ;;  %v4020_v54 = vpop.f32.mrb[39].mxu0  ;;  %v4069_v8 = vand.u32 65535, %v4068_v62 }
0x159a   :  { %v4029_v63 = vadd.f32 %v4020_v54, %v5469_v19 }
0x159b   :  { %v4033_v56 = vmul.f32 %v4030_v52, %v4030_v52  ;;  %v4071_v9 = vcvt.s32.f32 %v4069_v8 }
0x159c   :  { %v4032_v55 = vmul.f32 %v4029_v63, %v4029_v63 }
0x159d   :  { %v4037_v57 = vsel %vm187_vm3, %v4033_v56, 0.0 }
0x159e   :  { %4038 = vadd.xlane.f32.xlu0 %v4037_v57  ;;  %v4034_v59 = vsel %vm187_vm3, %v4032_v55, 0.0 }
0x159f   :  { %4035 = vadd.xlane.f32.xlu1 %v4034_v59 }
0x15a2   :  { %4075 = vadd.xlane.f32.xlu0 %v4072_v7 }
0x15a3   :  { %4073 = vadd.xlane.f32.xlu1 %v4071_v9 }
0x162b   :  { %v4039_v19 = vpop.xlane.xlu0 %4038 }
0x162c   :  { %v4041_v14 = vmul.f32 0.03125, %v4039_v19  ;;  %v4036_v60 = vpop.xlane.xlu1 %4035 }
0x162d   :  { %v4040_v3 = vmul.f32 0.03125, %v4036_v60 }
0x162e   :  { %v4043_v2 = vadd.f32 1e-06, %v4041_v14 }
0x162f   :  { %v4042_v16 = vadd.f32 1e-06, %v4040_v3  ;;  %v4076_v21 = vpop.xlane.xlu0 %4075 }
0x1630   :  { %4868 = vrsqrt.f32 %v4043_v2  ;;  %v4078_v58 = vcvt.f32.s32 %v4076_v21  ;;  %v4074_v24 = vpop.xlane.xlu1 %4073 }
0x1631   :  { %4870 = vrsqrt.f32 %v4042_v16  ;;  %v4077_v11 = vcvt.f32.s32 %v4074_v24 }
0x1632   :  { %v4079_v26 = vshll.u32 %v4078_v58, 16 }
0x1634   :  { %v4080_v27 = vadd.s32 %v4079_v26, %v4077_v11 }
0x1636   :  { %v4195_v28 = vadd.s32 4294967295, %v4080_v27  ;;  %vm4081_vm0 = vcmp.gt.s32.totalorder %v4080_v27, 0 }
0x1638   :  { %v4083_v30 = vsel %vm4081_vm0, %v4195_v28, 7 }
0x163a   :  { %v4869_v6 = vpop.eup %4868 }
0x163b   :  { %v4871_v10 = vpop.eup %4870  ;;  %v4047_v22 = vmul.f32 %v4869_v6, %v4030_v52 }
0x163c   :  { %v4046_v13 = vmul.f32 %v4871_v10, %v4029_v63 }
0x163d   :  { %v4053_v0 = vmul.f32 %v4193_v5, %v4047_v22 }
0x163e   :  { %v4052_v1 = vmul.f32 %v4193_v5, %v4046_v13 }
0x163f   :  { %v4060_v51 = vmul.f32 %v4194_v12, %v4053_v0 }
0x1640   :  { %v4059_v49 = vmul.f32 %v4194_v12, %v4052_v1 }
0x1641   :  { %v4064_v23 = vsel %vm187_vm3, %v4060_v51, 0.0 }
0x1642   :  { %4065 = vadd.xlane.f32.xlu1 %v4064_v23  ;;  %v4061_v20 = vsel %vm187_vm3, %v4059_v49, 0.0  ;;  %vm4084_vm3 = vcmp.eq.s32.totalorder %v4957_v17, %v4083_v30 }
0x1643   :  { %4062 = vadd.xlane.f32.xlu0 %v4061_v20 }
0x16cf   :  { %v4066_v18 = vpop.xlane.xlu1 %4065 }
0x16d0   :  { %v4094_v29 = vrot.slane %v4066_v18, %v4089_v25  ;;  %v4063_v31 = vpop.xlane.xlu0 %4062 }
0x16d1   :  { %v4090_v32 = vrot.slane %v4063_v31, %v4089_v25 }
0x16d3   :  { %v4096_v33 = vsel %vm4095_vm2, %v4094_v29, %v4090_v32 }
0x16d4   :  { %v4098_v15 = vsel %vm4084_vm3, %v4096_v33, 0.0 }
0x16d5   :  { %v4099_v34 = vsel %vm4067_vm1, %v4098_v15, 0.0 }
0x16d6   :  { %4100 = vadd.xlane.f32.xlu0 %v4099_v34 }
0x1763   :  { %v4101_v35 = vpop.xlane.xlu0 %4100 }
0x1764   :  { %4103 = vst.msk [vmem:[%s5505_s3] sm:$0x3] %vm4102_vm4, %v4101_v35 }
0x1765   :  { %4108 = vsyncpa [#allocation3], 1 }

</bundles_post_ra>
